<compile_context>
chip_gen: v5e
topology: v5e:2x2
jax: 0.10.0
libtpu: 0.0.40
codegen_flags: <defaults>
</compile_context>

<pallas_src>
import numpy as np

import jax
import jax.numpy as jnp
from jax.experimental import pallas as pl
from jax.experimental.pallas import tpu as pltpu

FEATURES = [3, 8, 16, 32]
CIN_PAD = 8  # zero-pad layer-1 input channels 3 -> 8 (clean sublane/lane packing)


def _vmem():
    return pl.BlockSpec(memory_space=pltpu.MemorySpace.VMEM)


# ------------------------------ fused kernel --------------------------------

def _fused_frame_encoder_kernel(slab1_ref, m1_ref, b1_ref, m2_ref, b2_ref,
                                m3_ref, b3_ref, wl_ref, bl_ref,
                                out_ref, slab2_ref, slab3_ref):
    """Entire FrameEncoder forward for a tiny batch, fully resident in VMEM.

    slabX_ref : (2, N, H/2 + 1, (W+2)*C)  row-parity-split, spatially padded
                activation rows; lane = flattened (padded column, channel).
    mX_ref    : (3, K, O) bf16 banded conv matrices (one per kernel row kh);
                output lanes = [even conv columns | odd conv columns] x Cout.
    bX_ref    : (1, O) f32 bias broadcast over output lanes.
    wl_ref    : (H_last, Wo_last*C_last, out) bf16 Linear weights, rows permuted
                to the kernel's activation lane order (NCHW flatten folded in).
    """
    # Zero scratch slabs once so padding rows / pad-column lanes read as 0.
    slab2_ref[...] = jnp.zeros(slab2_ref.shape, slab2_ref.dtype)
    slab3_ref[...] = jnp.zeros(slab3_ref.shape, slab3_ref.dtype)

    n_batch = out_ref.shape[0]

    def conv_relu_pool(slab_ref, m_ref, b_ref, n):
        """Conv3x3(SAME) + bias + ReLU + MaxPool2 for sample n -> (Hh, O//2) f32."""
        hh = slab_ref.shape[2] - 1
        # Padded input rows, read as contiguous slices of the parity-split slab.
        a0 = slab_ref[0, n, 0:hh, :].astype(jnp.bfloat16)      # rows 2j
        a1 = slab_ref[1, n, 0:hh, :].astype(jnp.bfloat16)      # rows 2j+1
        a2 = slab_ref[0, n, 1:hh + 1, :].astype(jnp.bfloat16)  # rows 2j+2
        a3 = slab_ref[1, n, 1:hh + 1, :].astype(jnp.bfloat16)  # rows 2j+3
        w0 = m_ref[0]
        w1 = m_ref[1]
        w2 = m_ref[2]
        b = b_ref[...]

        def dot(a, w):
            return jnp.dot(a, w, preferred_element_type=jnp.float32)

        even = dot(a0, w0) + dot(a1, w1) + dot(a2, w2) + b   # conv output rows 2j
        odd = dot(a1, w0) + dot(a2, w1) + dot(a3, w2) + b    # conv output rows 2j+1
        even = jnp.maximum(even, 0.0)
        odd = jnp.maximum(odd, 0.0)
        half = even.shape[-1] // 2
        # 2x2 max-pool: row pairs are (even, odd); column pairs are the two
        # lane halves (even / odd conv columns, by weight-matrix construction).
        return jnp.maximum(jnp.maximum(even[:, :half], even[:, half:]),
                           jnp.maximum(odd[:, :half], odd[:, half:]))

    def scatter_rows(pooled, dst_ref, n):
        """Write pooled rows into the next layer's parity-split padded slab."""
        rows, lanes = pooled.shape
        for j in range(rows):            # tiny static unroll (<= 8 rows)
            r = j + 1                    # +1: top spatial padding row
            dst_ref[r % 2, n, r // 2:r // 2 + 1, 0:lanes] = pooled[j:j + 1, :]

    for n in range(n_batch):             # static unroll, tiny batch
        p1 = conv_relu_pool(slab1_ref, m1_ref, b1_ref, n)
        scatter_rows(p1, slab2_ref, n)
        p2 = conv_relu_pool(slab2_ref, m2_ref, b2_ref, n)
        scatter_rows(p2, slab3_ref, n)
        p3 = conv_relu_pool(slab3_ref, m3_ref, b3_ref, n)

        # Linear (Flatten folded into pre-permuted weights -> no transpose).
        y = bl_ref[...]
        for h in range(p3.shape[0]):
            y = y + jnp.dot(p3[h:h + 1, :].astype(jnp.bfloat16), wl_ref[h],
                            preferred_element_type=jnp.float32)
        out_ref[n:n + 1, :] = y


# ------------------------------- JAX wrapper ---------------------------------

def _prep_input(x_nchw):
    """NCHW frame -> (2, N, H/2+1, (W+2)*CIN_PAD) row-parity-split padded slab."""
    n, c, h, w = x_nchw.shape
    x = jnp.transpose(x_nchw, (0, 2, 3, 1))                      # NHWC
    x = jnp.pad(x, ((0, 0), (0, 0), (0, 0), (0, CIN_PAD - c)))   # channels -> 8
    x = jnp.pad(x, ((0, 0), (1, 1), (1, 1), (0, 0)))             # SAME spatial pad
    x = x.reshape(n, h + 2, (w + 2) * CIN_PAD)                   # lane = w*C + c
    return jnp.stack([x[:, 0::2, :], x[:, 1::2, :]], axis=0)


def frame_encoder_forward(x_nchw, kparams):
    n, _, h, w = x_nchw.shape
    assert h % 8 == 0 and w % 8 == 0, "frame dims must be divisible by 8"
    slab1 = _prep_input(x_nchw)
    h2, w2 = h // 2, w // 2
    h3, w3 = h // 4, w // 4
    c1, c2 = FEATURES[1], FEATURES[2]
    out_features = kparams["bl"].shape[-1]

    return pl.pallas_call(
        _fused_frame_encoder_kernel,
        out_shape=jax.ShapeDtypeStruct((n, out_features), jnp.float32),
        in_specs=[_vmem()] * 9,
        out_specs=_vmem(),
        scratch_shapes=[
            pltpu.VMEM((2, n, h2 // 2 + 1, (w2 + 2) * c1), jnp.float32),
            pltpu.VMEM((2, n, h3 // 2 + 1, (w3 + 2) * c2), jnp.float32),
        ],
    )(slab1, kparams["m1"], kparams["b1"], kparams["m2"], kparams["b2"],
      kparams["m3"], kparams["b3"], kparams["wl"], kparams["bl"])


# --------------------------- parameter preparation ---------------------------

def init_params(key, frame_dims, out_features):
    """PyTorch-layout parameters (HWIO conv weights, (in,out) linear weight)."""
    n_layers = len(FEATURES) - 1
    keys = jax.random.split(key, 2 * n_layers + 2)
    params = {"conv": []}
    for i in range(n_layers):
        cin, cout = FEATURES[i], FEATURES[i + 1]
        fan_in = 9 * cin
        w = jax.random.normal(keys[2 * i], (3, 3, cin, cout), jnp.float32) / jnp.sqrt(fan_in)
        b = jax.random.normal(keys[2 * i + 1], (cout,), jnp.float32) * 0.01
        params["conv"].append((w, b))
    f_in = FEATURES[-1] * (frame_dims[0] >> n_layers) * (frame_dims[1] >> n_layers)
    params["lin_w"] = jax.random.normal(keys[-2], (f_in, out_features), jnp.float32) / jnp.sqrt(f_in)
    params["lin_b"] = jax.random.normal(keys[-1], (out_features,), jnp.float32) * 0.01
    return params


def prepare_kernel_params(params, frame_dims):
    """One-time repack of PyTorch-layout params into fused-kernel operands."""
    h, w = frame_dims
    n_layers = len(FEATURES) - 1
    kp = {}
    w_l = w
    for l in range(n_layers):
        w_hwio = np.asarray(params["conv"][l][0])   # (3,3,cin,cout)
        bias = np.asarray(params["conv"][l][1])
        cin, cout = FEATURES[l], FEATURES[l + 1]
        cin_store = CIN_PAD if l == 0 else cin      # channels stored per slab column

        if l == 0:
            def lane_of(wp, c, C=cin_store):
                return wp * C + c                   # natural (w, c) order
        else:
            def lane_of(wp, c, W=w_l, C=cin_store):
                if 1 <= wp <= W:
                    return (wp - 1) * C + c         # interior columns first
                return W * C + c if wp == 0 else W * C + C + c   # pad cols last

        K = (w_l + 2) * cin_store
        O = w_l * cout
        wo = w_l // 2
        M = np.zeros((3, K, O), np.float32)
        for kh in range(3):
            for w_t in range(w_l):                  # conv output column
                parity, j = w_t % 2, w_t // 2
                base = parity * wo * cout + j * cout
                for kw in range(3):
                    wp = w_t + kw                   # padded input column
                    for c in range(cin):
                        M[kh, lane_of(wp, c), base:base + cout] = w_hwio[kh, kw, c, :]
        kp[f"m{l + 1}"] = jnp.asarray(M, jnp.bfloat16)
        kp[f"b{l + 1}"] = jnp.asarray(np.tile(bias, w_l)[None, :], jnp.float32)
        w_l //= 2

    # Linear: fold the PyTorch NCHW Flatten order into the weight rows.
    c3 = FEATURES[-1]
    h3, w3 = h >> n_layers, w >> n_layers
    lw = np.asarray(params["lin_w"])                # rows in (c, h, w) flatten order
    out_f = lw.shape[1]
    WL = np.zeros((h3, w3 * c3, out_f), np.float32)
    for hh in range(h3):
        for j in range(w3):
            for c in range(c3):
                WL[hh, j * c3 + c, :] = lw[c * (h3 * w3) + hh * w3 + j, :]
    kp["wl"] = jnp.asarray(WL, jnp.bfloat16)
    kp["bl"] = jnp.asarray(np.asarray(params["lin_b"])[None, :], jnp.float32)
    return kp


# ------------------------------- pure-JAX ref --------------------------------

def reference_forward(x_nchw, params):
    x = jnp.transpose(x_nchw, (0, 2, 3, 1))
    for (w, b) in params["conv"]:
        y = jax.lax.conv_general_dilated(
            x, w, window_strides=(1, 1), padding="SAME",
            dimension_numbers=("NHWC", "HWIO", "NHWC"))
        y = jnp.maximum(y + b, 0.0)
        x = jax.lax.reduce_window(y, -jnp.inf, jax.lax.max,
                                  (1, 2, 2, 1), (1, 2, 2, 1), "VALID")
    n = x.shape[0]
    xf = jnp.transpose(x, (0, 3, 1, 2)).reshape(n, -1)
    return xf @ params["lin_w"] + params["lin_b"]


# ----------------------------------- main ------------------------------------

if __name__ == "__main__":
    key = jax.random.PRNGKey(0)
    k_x, k_p = jax.random.split(key)

    frame_dims = (16, 16)
    out_features = 32
    batch = 2

    x = jax.random.normal(k_x, (batch, FEATURES[0], frame_dims[0], frame_dims[1]),
                          jnp.float32)
    params = init_params(k_p, frame_dims, out_features)
    kparams = prepare_kernel_params(params, frame_dims)   # one-time repack

    fwd = jax.jit(frame_encoder_forward)
    y = jax.block_until_ready(fwd(x, kparams))

    assert y.shape == (batch, out_features), y.shape

    y_ref = reference_forward(x, params)
    # Tolerance slightly looser than f32-only: the kernel feeds the MXU bf16
    # operands (f32 accumulate) per the perf guidance.
    assert jnp.allclose(y, y_ref, atol=2e-2, rtol=2e-2), (
        "mismatch vs reference", float(jnp.max(jnp.abs(y - y_ref))))

    print("KERNEL_OK")
</pallas_src>

<mosaic_0001>
module attributes {stable_mosaic.version = 11 : i64} {
  func.func @_fused_frame_encoder_kernel(%arg0: memref<2x2x9x144xf32, #tpu.memory_space<vmem>>, %arg1: memref<3x144x128xbf16, #tpu.memory_space<vmem>>, %arg2: memref<1x128xf32, #tpu.memory_space<vmem>>, %arg3: memref<3x80x128xbf16, #tpu.memory_space<vmem>>, %arg4: memref<1x128xf32, #tpu.memory_space<vmem>>, %arg5: memref<3x96x128xbf16, #tpu.memory_space<vmem>>, %arg6: memref<1x128xf32, #tpu.memory_space<vmem>>, %arg7: memref<2x64x32xbf16, #tpu.memory_space<vmem>>, %arg8: memref<1x32xf32, #tpu.memory_space<vmem>>, %arg9: memref<2x32xf32, #tpu.memory_space<vmem>>, %arg10: memref<2x2x5x80xf32, #tpu.memory_space<vmem>>, %arg11: memref<2x2x3x96xf32, #tpu.memory_space<vmem>>) attributes {dimension_semantics = [], scalar_prefetch = 0 : i64, scratch_operands = 2 : i64, tpu.core_type = #tpu.core_type<tc>} {
    %cst = arith.constant 0.000000e+00 : f32
    %0 = vector.broadcast %cst : f32 to vector<2x2x5x80xf32>
    %c0 = arith.constant 0 : index
    %c0_0 = arith.constant 0 : index
    %c0_1 = arith.constant 0 : index
    %c0_2 = arith.constant 0 : index
    %1 = vector.load %arg10[%c0, %c0_0, %c0_1, %c0_2] : memref<2x2x5x80xf32, #tpu.memory_space<vmem>>, vector<2x2x5x80xf32>
    tpu.vector_store %arg10[%c0, %c0_0, %c0_1, %c0_2], %0 {strides = array<i32>} : memref<2x2x5x80xf32, #tpu.memory_space<vmem>>, vector<2x2x5x80xf32>,
    %cst_3 = arith.constant 0.000000e+00 : f32
    %2 = vector.broadcast %cst_3 : f32 to vector<2x2x3x96xf32>
    %c0_4 = arith.constant 0 : index
    %c0_5 = arith.constant 0 : index
    %c0_6 = arith.constant 0 : index
    %c0_7 = arith.constant 0 : index
    %3 = vector.load %arg11[%c0_4, %c0_5, %c0_6, %c0_7] : memref<2x2x3x96xf32, #tpu.memory_space<vmem>>, vector<2x2x3x96xf32>
    tpu.vector_store %arg11[%c0_4, %c0_5, %c0_6, %c0_7], %2 {strides = array<i32>} : memref<2x2x3x96xf32, #tpu.memory_space<vmem>>, vector<2x2x3x96xf32>,
    %c0_8 = arith.constant 0 : index
    %c0_9 = arith.constant 0 : index
    %c0_10 = arith.constant 0 : index
    %c0_11 = arith.constant 0 : index
    %4 = vector.load %arg0[%c0_8, %c0_9, %c0_10, %c0_11] : memref<2x2x9x144xf32, #tpu.memory_space<vmem>>, vector<1x1x8x144xf32>
    %5 = vector.shape_cast %4 : vector<1x1x8x144xf32> to vector<8x144xf32>
    %6 = arith.truncf %5 : vector<8x144xf32> to vector<8x144xbf16>
    %c1 = arith.constant 1 : index
    %c0_12 = arith.constant 0 : index
    %c0_13 = arith.constant 0 : index
    %c0_14 = arith.constant 0 : index
    %7 = vector.load %arg0[%c1, %c0_12, %c0_13, %c0_14] : memref<2x2x9x144xf32, #tpu.memory_space<vmem>>, vector<1x1x8x144xf32>
    %8 = vector.shape_cast %7 : vector<1x1x8x144xf32> to vector<8x144xf32>
    %9 = arith.truncf %8 : vector<8x144xf32> to vector<8x144xbf16>
    %c0_15 = arith.constant 0 : index
    %c0_16 = arith.constant 0 : index
    %c1_17 = arith.constant 1 : index
    %c0_18 = arith.constant 0 : index
    %10 = vector.load %arg0[%c0_15, %c0_16, %c1_17, %c0_18] : memref<2x2x9x144xf32, #tpu.memory_space<vmem>>, vector<1x1x8x144xf32>
    %11 = vector.shape_cast %10 : vector<1x1x8x144xf32> to vector<8x144xf32>
    %12 = arith.truncf %11 : vector<8x144xf32> to vector<8x144xbf16>
    %c1_19 = arith.constant 1 : index
    %c0_20 = arith.constant 0 : index
    %c1_21 = arith.constant 1 : index
    %c0_22 = arith.constant 0 : index
    %13 = vector.load %arg0[%c1_19, %c0_20, %c1_21, %c0_22] : memref<2x2x9x144xf32, #tpu.memory_space<vmem>>, vector<1x1x8x144xf32>
    %14 = vector.shape_cast %13 : vector<1x1x8x144xf32> to vector<8x144xf32>
    %15 = arith.truncf %14 : vector<8x144xf32> to vector<8x144xbf16>
    %c0_23 = arith.constant 0 : index
    %c0_24 = arith.constant 0 : index
    %c0_25 = arith.constant 0 : index
    %16 = vector.load %arg1[%c0_23, %c0_24, %c0_25] : memref<3x144x128xbf16, #tpu.memory_space<vmem>>, vector<1x144x128xbf16>
    %17 = vector.shape_cast %16 : vector<1x144x128xbf16> to vector<144x128xbf16>
    %c1_26 = arith.constant 1 : index
    %c0_27 = arith.constant 0 : index
    %c0_28 = arith.constant 0 : index
    %18 = vector.load %arg1[%c1_26, %c0_27, %c0_28] : memref<3x144x128xbf16, #tpu.memory_space<vmem>>, vector<1x144x128xbf16>
    %19 = vector.shape_cast %18 : vector<1x144x128xbf16> to vector<144x128xbf16>
    %c2 = arith.constant 2 : index
    %c0_29 = arith.constant 0 : index
    %c0_30 = arith.constant 0 : index
    %20 = vector.load %arg1[%c2, %c0_29, %c0_30] : memref<3x144x128xbf16, #tpu.memory_space<vmem>>, vector<1x144x128xbf16>
    %21 = vector.shape_cast %20 : vector<1x144x128xbf16> to vector<144x128xbf16>
    %c0_31 = arith.constant 0 : index
    %c0_32 = arith.constant 0 : index
    %22 = vector.load %arg2[%c0_31, %c0_32] : memref<1x128xf32, #tpu.memory_space<vmem>>, vector<1x128xf32>
    %cst_33 = arith.constant dense<0.000000e+00> : vector<8x128xf32>
    %23 = tpu.matmul %6, %17, %cst_33 {dimension_numbers = #tpu.dot_dimension_numbers<[1], [0], [0], [1], [0, 0, 1, 1], [], []>} : vector<8x144xbf16>, vector<144x128xbf16>, vector<8x128xf32> -> vector<8x128xf32>
    %cst_34 = arith.constant dense<0.000000e+00> : vector<8x128xf32>
    %24 = tpu.matmul %9, %19, %cst_34 {dimension_numbers = #tpu.dot_dimension_numbers<[1], [0], [0], [1], [0, 0, 1, 1], [], []>} : vector<8x144xbf16>, vector<144x128xbf16>, vector<8x128xf32> -> vector<8x128xf32>
    %25 = arith.addf %23, %24 : vector<8x128xf32>
    %cst_35 = arith.constant dense<0.000000e+00> : vector<8x128xf32>
    %26 = tpu.matmul %12, %21, %cst_35 {dimension_numbers = #tpu.dot_dimension_numbers<[1], [0], [0], [1], [0, 0, 1, 1], [], []>} : vector<8x144xbf16>, vector<144x128xbf16>, vector<8x128xf32> -> vector<8x128xf32>
    %27 = arith.addf %25, %26 : vector<8x128xf32>
    %28 = vector.broadcast %22 : vector<1x128xf32> to vector<8x128xf32>
    %29 = arith.addf %27, %28 : vector<8x128xf32>
    %cst_36 = arith.constant dense<0.000000e+00> : vector<8x128xf32>
    %30 = tpu.matmul %9, %17, %cst_36 {dimension_numbers = #tpu.dot_dimension_numbers<[1], [0], [0], [1], [0, 0, 1, 1], [], []>} : vector<8x144xbf16>, vector<144x128xbf16>, vector<8x128xf32> -> vector<8x128xf32>
    %cst_37 = arith.constant dense<0.000000e+00> : vector<8x128xf32>
    %31 = tpu.matmul %12, %19, %cst_37 {dimension_numbers = #tpu.dot_dimension_numbers<[1], [0], [0], [1], [0, 0, 1, 1], [], []>} : vector<8x144xbf16>, vector<144x128xbf16>, vector<8x128xf32> -> vector<8x128xf32>
    %32 = arith.addf %30, %31 : vector<8x128xf32>
    %cst_38 = arith.constant dense<0.000000e+00> : vector<8x128xf32>
    %33 = tpu.matmul %15, %21, %cst_38 {dimension_numbers = #tpu.dot_dimension_numbers<[1], [0], [0], [1], [0, 0, 1, 1], [], []>} : vector<8x144xbf16>, vector<144x128xbf16>, vector<8x128xf32> -> vector<8x128xf32>
    %34 = arith.addf %32, %33 : vector<8x128xf32>
    %35 = vector.broadcast %22 : vector<1x128xf32> to vector<8x128xf32>
    %36 = arith.addf %34, %35 : vector<8x128xf32>
    %cst_39 = arith.constant 0.000000e+00 : f32
    %37 = vector.broadcast %cst_39 : f32 to vector<8x128xf32>
    %38 = arith.maximumf %29, %37 : vector<8x128xf32>
    %cst_40 = arith.constant 0.000000e+00 : f32
    %39 = vector.broadcast %cst_40 : f32 to vector<8x128xf32>
    %40 = arith.maximumf %36, %39 : vector<8x128xf32>
    %41 = vector.extract_strided_slice %38 {offsets = [0, 0], sizes = [8, 64], strides = [1, 1]} : vector<8x128xf32> to vector<8x64xf32>
    %42 = vector.extract_strided_slice %38 {offsets = [0, 64], sizes = [8, 64], strides = [1, 1]} : vector<8x128xf32> to vector<8x64xf32>
    %43 = arith.maximumf %41, %42 : vector<8x64xf32>
    %44 = vector.extract_strided_slice %40 {offsets = [0, 0], sizes = [8, 64], strides = [1, 1]} : vector<8x128xf32> to vector<8x64xf32>
    %45 = vector.extract_strided_slice %40 {offsets = [0, 64], sizes = [8, 64], strides = [1, 1]} : vector<8x128xf32> to vector<8x64xf32>
    %46 = arith.maximumf %44, %45 : vector<8x64xf32>
    %47 = arith.maximumf %43, %46 : vector<8x64xf32>
    %48 = vector.extract_strided_slice %47 {offsets = [0, 0], sizes = [1, 64], strides = [1, 1]} : vector<8x64xf32> to vector<1x64xf32>
    %c1_41 = arith.constant 1 : index
    %c0_42 = arith.constant 0 : index
    %c0_43 = arith.constant 0 : index
    %c0_44 = arith.constant 0 : index
    %49 = vector.load %arg10[%c1_41, %c0_42, %c0_43, %c0_44] : memref<2x2x5x80xf32, #tpu.memory_space<vmem>>, vector<1x1x1x64xf32>
    %50 = vector.shape_cast %49 : vector<1x1x1x64xf32> to vector<1x64xf32>
    %51 = vector.shape_cast %48 : vector<1x64xf32> to vector<1x1x1x64xf32>
    tpu.vector_store %arg10[%c1_41, %c0_42, %c0_43, %c0_44], %51 {strides = array<i32>} : memref<2x2x5x80xf32, #tpu.memory_space<vmem>>, vector<1x1x1x64xf32>,
    %52 = vector.extract_strided_slice %47 {offsets = [1, 0], sizes = [1, 64], strides = [1, 1]} : vector<8x64xf32> to vector<1x64xf32>
    %c0_45 = arith.constant 0 : index
    %c0_46 = arith.constant 0 : index
    %c1_47 = arith.constant 1 : index
    %c0_48 = arith.constant 0 : index
    %53 = vector.load %arg10[%c0_45, %c0_46, %c1_47, %c0_48] : memref<2x2x5x80xf32, #tpu.memory_space<vmem>>, vector<1x1x1x64xf32>
    %54 = vector.shape_cast %53 : vector<1x1x1x64xf32> to vector<1x64xf32>
    %55 = vector.shape_cast %52 : vector<1x64xf32> to vector<1x1x1x64xf32>
    tpu.vector_store %arg10[%c0_45, %c0_46, %c1_47, %c0_48], %55 {strides = array<i32>} : memref<2x2x5x80xf32, #tpu.memory_space<vmem>>, vector<1x1x1x64xf32>,
    %56 = vector.extract_strided_slice %47 {offsets = [2, 0], sizes = [1, 64], strides = [1, 1]} : vector<8x64xf32> to vector<1x64xf32>
    %c1_49 = arith.constant 1 : index
    %c0_50 = arith.constant 0 : index
    %c1_51 = arith.constant 1 : index
    %c0_52 = arith.constant 0 : index
    %57 = vector.load %arg10[%c1_49, %c0_50, %c1_51, %c0_52] : memref<2x2x5x80xf32, #tpu.memory_space<vmem>>, vector<1x1x1x64xf32>
    %58 = vector.shape_cast %57 : vector<1x1x1x64xf32> to vector<1x64xf32>
    %59 = vector.shape_cast %56 : vector<1x64xf32> to vector<1x1x1x64xf32>
    tpu.vector_store %arg10[%c1_49, %c0_50, %c1_51, %c0_52], %59 {strides = array<i32>} : memref<2x2x5x80xf32, #tpu.memory_space<vmem>>, vector<1x1x1x64xf32>,
    %60 = vector.extract_strided_slice %47 {offsets = [3, 0], sizes = [1, 64], strides = [1, 1]} : vector<8x64xf32> to vector<1x64xf32>
    %c0_53 = arith.constant 0 : index
    %c0_54 = arith.constant 0 : index
    %c2_55 = arith.constant 2 : index
    %c0_56 = arith.constant 0 : index
    %61 = vector.load %arg10[%c0_53, %c0_54, %c2_55, %c0_56] : memref<2x2x5x80xf32, #tpu.memory_space<vmem>>, vector<1x1x1x64xf32>
    %62 = vector.shape_cast %61 : vector<1x1x1x64xf32> to vector<1x64xf32>
    %63 = vector.shape_cast %60 : vector<1x64xf32> to vector<1x1x1x64xf32>
    tpu.vector_store %arg10[%c0_53, %c0_54, %c2_55, %c0_56], %63 {strides = array<i32>} : memref<2x2x5x80xf32, #tpu.memory_space<vmem>>, vector<1x1x1x64xf32>,
    %64 = vector.extract_strided_slice %47 {offsets = [4, 0], sizes = [1, 64], strides = [1, 1]} : vector<8x64xf32> to vector<1x64xf32>
    %c1_57 = arith.constant 1 : index
    %c0_58 = arith.constant 0 : index
    %c2_59 = arith.constant 2 : index
    %c0_60 = arith.constant 0 : index
    %65 = vector.load %arg10[%c1_57, %c0_58, %c2_59, %c0_60] : memref<2x2x5x80xf32, #tpu.memory_space<vmem>>, vector<1x1x1x64xf32>
    %66 = vector.shape_cast %65 : vector<1x1x1x64xf32> to vector<1x64xf32>
    %67 = vector.shape_cast %64 : vector<1x64xf32> to vector<1x1x1x64xf32>
    tpu.vector_store %arg10[%c1_57, %c0_58, %c2_59, %c0_60], %67 {strides = array<i32>} : memref<2x2x5x80xf32, #tpu.memory_space<vmem>>, vector<1x1x1x64xf32>,
    %68 = vector.extract_strided_slice %47 {offsets = [5, 0], sizes = [1, 64], strides = [1, 1]} : vector<8x64xf32> to vector<1x64xf32>
    %c0_61 = arith.constant 0 : index
    %c0_62 = arith.constant 0 : index
    %c3 = arith.constant 3 : index
    %c0_63 = arith.constant 0 : index
    %69 = vector.load %arg10[%c0_61, %c0_62, %c3, %c0_63] : memref<2x2x5x80xf32, #tpu.memory_space<vmem>>, vector<1x1x1x64xf32>
    %70 = vector.shape_cast %69 : vector<1x1x1x64xf32> to vector<1x64xf32>
    %71 = vector.shape_cast %68 : vector<1x64xf32> to vector<1x1x1x64xf32>
    tpu.vector_store %arg10[%c0_61, %c0_62, %c3, %c0_63], %71 {strides = array<i32>} : memref<2x2x5x80xf32, #tpu.memory_space<vmem>>, vector<1x1x1x64xf32>,
    %72 = vector.extract_strided_slice %47 {offsets = [6, 0], sizes = [1, 64], strides = [1, 1]} : vector<8x64xf32> to vector<1x64xf32>
    %c1_64 = arith.constant 1 : index
    %c0_65 = arith.constant 0 : index
    %c3_66 = arith.constant 3 : index
    %c0_67 = arith.constant 0 : index
    %73 = vector.load %arg10[%c1_64, %c0_65, %c3_66, %c0_67] : memref<2x2x5x80xf32, #tpu.memory_space<vmem>>, vector<1x1x1x64xf32>
    %74 = vector.shape_cast %73 : vector<1x1x1x64xf32> to vector<1x64xf32>
    %75 = vector.shape_cast %72 : vector<1x64xf32> to vector<1x1x1x64xf32>
    tpu.vector_store %arg10[%c1_64, %c0_65, %c3_66, %c0_67], %75 {strides = array<i32>} : memref<2x2x5x80xf32, #tpu.memory_space<vmem>>, vector<1x1x1x64xf32>,
    %76 = vector.extract_strided_slice %47 {offsets = [7, 0], sizes = [1, 64], strides = [1, 1]} : vector<8x64xf32> to vector<1x64xf32>
    %c0_68 = arith.constant 0 : index
    %c0_69 = arith.constant 0 : index
    %c4 = arith.constant 4 : index
    %c0_70 = arith.constant 0 : index
    %77 = vector.load %arg10[%c0_68, %c0_69, %c4, %c0_70] : memref<2x2x5x80xf32, #tpu.memory_space<vmem>>, vector<1x1x1x64xf32>
    %78 = vector.shape_cast %77 : vector<1x1x1x64xf32> to vector<1x64xf32>
    %79 = vector.shape_cast %76 : vector<1x64xf32> to vector<1x1x1x64xf32>
    tpu.vector_store %arg10[%c0_68, %c0_69, %c4, %c0_70], %79 {strides = array<i32>} : memref<2x2x5x80xf32, #tpu.memory_space<vmem>>, vector<1x1x1x64xf32>,
    %c0_71 = arith.constant 0 : index
    %c0_72 = arith.constant 0 : index
    %c0_73 = arith.constant 0 : index
    %c0_74 = arith.constant 0 : index
    %80 = vector.load %arg10[%c0_71, %c0_72, %c0_73, %c0_74] : memref<2x2x5x80xf32, #tpu.memory_space<vmem>>, vector<1x1x4x80xf32>
    %81 = vector.shape_cast %80 : vector<1x1x4x80xf32> to vector<4x80xf32>
    %82 = arith.truncf %81 : vector<4x80xf32> to vector<4x80xbf16>
    %c1_75 = arith.constant 1 : index
    %c0_76 = arith.constant 0 : index
    %c0_77 = arith.constant 0 : index
    %c0_78 = arith.constant 0 : index
    %83 = vector.load %arg10[%c1_75, %c0_76, %c0_77, %c0_78] : memref<2x2x5x80xf32, #tpu.memory_space<vmem>>, vector<1x1x4x80xf32>
    %84 = vector.shape_cast %83 : vector<1x1x4x80xf32> to vector<4x80xf32>
    %85 = arith.truncf %84 : vector<4x80xf32> to vector<4x80xbf16>
    %c0_79 = arith.constant 0 : index
    %c0_80 = arith.constant 0 : index
    %c1_81 = arith.constant 1 : index
    %c0_82 = arith.constant 0 : index
    %86 = vector.load %arg10[%c0_79, %c0_80, %c1_81, %c0_82] : memref<2x2x5x80xf32, #tpu.memory_space<vmem>>, vector<1x1x4x80xf32>
    %87 = vector.shape_cast %86 : vector<1x1x4x80xf32> to vector<4x80xf32>
    %88 = arith.truncf %87 : vector<4x80xf32> to vector<4x80xbf16>
    %c1_83 = arith.constant 1 : index
    %c0_84 = arith.constant 0 : index
    %c1_85 = arith.constant 1 : index
    %c0_86 = arith.constant 0 : index
    %89 = vector.load %arg10[%c1_83, %c0_84, %c1_85, %c0_86] : memref<2x2x5x80xf32, #tpu.memory_space<vmem>>, vector<1x1x4x80xf32>
    %90 = vector.shape_cast %89 : vector<1x1x4x80xf32> to vector<4x80xf32>
    %91 = arith.truncf %90 : vector<4x80xf32> to vector<4x80xbf16>
    %c0_87 = arith.constant 0 : index
    %c0_88 = arith.constant 0 : index
    %c0_89 = arith.constant 0 : index
    %92 = vector.load %arg3[%c0_87, %c0_88, %c0_89] : memref<3x80x128xbf16, #tpu.memory_space<vmem>>, vector<1x80x128xbf16>
    %93 = vector.shape_cast %92 : vector<1x80x128xbf16> to vector<80x128xbf16>
    %c1_90 = arith.constant 1 : index
    %c0_91 = arith.constant 0 : index
    %c0_92 = arith.constant 0 : index
    %94 = vector.load %arg3[%c1_90, %c0_91, %c0_92] : memref<3x80x128xbf16, #tpu.memory_space<vmem>>, vector<1x80x128xbf16>
    %95 = vector.shape_cast %94 : vector<1x80x128xbf16> to vector<80x128xbf16>
    %c2_93 = arith.constant 2 : index
    %c0_94 = arith.constant 0 : index
    %c0_95 = arith.constant 0 : index
    %96 = vector.load %arg3[%c2_93, %c0_94, %c0_95] : memref<3x80x128xbf16, #tpu.memory_space<vmem>>, vector<1x80x128xbf16>
    %97 = vector.shape_cast %96 : vector<1x80x128xbf16> to vector<80x128xbf16>
    %c0_96 = arith.constant 0 : index
    %c0_97 = arith.constant 0 : index
    %98 = vector.load %arg4[%c0_96, %c0_97] : memref<1x128xf32, #tpu.memory_space<vmem>>, vector<1x128xf32>
    %cst_98 = arith.constant dense<0.000000e+00> : vector<4x128xf32>
    %99 = tpu.matmul %82, %93, %cst_98 {dimension_numbers = #tpu.dot_dimension_numbers<[1], [0], [0], [1], [0, 0, 1, 1], [], []>} : vector<4x80xbf16>, vector<80x128xbf16>, vector<4x128xf32> -> vector<4x128xf32>
    %cst_99 = arith.constant dense<0.000000e+00> : vector<4x128xf32>
    %100 = tpu.matmul %85, %95, %cst_99 {dimension_numbers = #tpu.dot_dimension_numbers<[1], [0], [0], [1], [0, 0, 1, 1], [], []>} : vector<4x80xbf16>, vector<80x128xbf16>, vector<4x128xf32> -> vector<4x128xf32>
    %101 = arith.addf %99, %100 : vector<4x128xf32>
    %cst_100 = arith.constant dense<0.000000e+00> : vector<4x128xf32>
    %102 = tpu.matmul %88, %97, %cst_100 {dimension_numbers = #tpu.dot_dimension_numbers<[1], [0], [0], [1], [0, 0, 1, 1], [], []>} : vector<4x80xbf16>, vector<80x128xbf16>, vector<4x128xf32> -> vector<4x128xf32>
    %103 = arith.addf %101, %102 : vector<4x128xf32>
    %104 = vector.broadcast %98 : vector<1x128xf32> to vector<4x128xf32>
    %105 = arith.addf %103, %104 : vector<4x128xf32>
    %cst_101 = arith.constant dense<0.000000e+00> : vector<4x128xf32>
    %106 = tpu.matmul %85, %93, %cst_101 {dimension_numbers = #tpu.dot_dimension_numbers<[1], [0], [0], [1], [0, 0, 1, 1], [], []>} : vector<4x80xbf16>, vector<80x128xbf16>, vector<4x128xf32> -> vector<4x128xf32>
    %cst_102 = arith.constant dense<0.000000e+00> : vector<4x128xf32>
    %107 = tpu.matmul %88, %95, %cst_102 {dimension_numbers = #tpu.dot_dimension_numbers<[1], [0], [0], [1], [0, 0, 1, 1], [], []>} : vector<4x80xbf16>, vector<80x128xbf16>, vector<4x128xf32> -> vector<4x128xf32>
    %108 = arith.addf %106, %107 : vector<4x128xf32>
    %cst_103 = arith.constant dense<0.000000e+00> : vector<4x128xf32>
    %109 = tpu.matmul %91, %97, %cst_103 {dimension_numbers = #tpu.dot_dimension_numbers<[1], [0], [0], [1], [0, 0, 1, 1], [], []>} : vector<4x80xbf16>, vector<80x128xbf16>, vector<4x128xf32> -> vector<4x128xf32>
    %110 = arith.addf %108, %109 : vector<4x128xf32>
    %111 = vector.broadcast %98 : vector<1x128xf32> to vector<4x128xf32>
    %112 = arith.addf %110, %111 : vector<4x128xf32>
    %cst_104 = arith.constant 0.000000e+00 : f32
    %113 = vector.broadcast %cst_104 : f32 to vector<4x128xf32>
    %114 = arith.maximumf %105, %113 : vector<4x128xf32>
    %cst_105 = arith.constant 0.000000e+00 : f32
    %115 = vector.broadcast %cst_105 : f32 to vector<4x128xf32>
    %116 = arith.maximumf %112, %115 : vector<4x128xf32>
    %117 = vector.extract_strided_slice %114 {offsets = [0, 0], sizes = [4, 64], strides = [1, 1]} : vector<4x128xf32> to vector<4x64xf32>
    %118 = vector.extract_strided_slice %114 {offsets = [0, 64], sizes = [4, 64], strides = [1, 1]} : vector<4x128xf32> to vector<4x64xf32>
    %119 = arith.maximumf %117, %118 : vector<4x64xf32>
    %120 = vector.extract_strided_slice %116 {offsets = [0, 0], sizes = [4, 64], strides = [1, 1]} : vector<4x128xf32> to vector<4x64xf32>
    %121 = vector.extract_strided_slice %116 {offsets = [0, 64], sizes = [4, 64], strides = [1, 1]} : vector<4x128xf32> to vector<4x64xf32>
    %122 = arith.maximumf %120, %121 : vector<4x64xf32>
    %123 = arith.maximumf %119, %122 : vector<4x64xf32>
    %124 = vector.extract_strided_slice %123 {offsets = [0, 0], sizes = [1, 64], strides = [1, 1]} : vector<4x64xf32> to vector<1x64xf32>
    %c1_106 = arith.constant 1 : index
    %c0_107 = arith.constant 0 : index
    %c0_108 = arith.constant 0 : index
    %c0_109 = arith.constant 0 : index
    %125 = vector.load %arg11[%c1_106, %c0_107, %c0_108, %c0_109] : memref<2x2x3x96xf32, #tpu.memory_space<vmem>>, vector<1x1x1x64xf32>
    %126 = vector.shape_cast %125 : vector<1x1x1x64xf32> to vector<1x64xf32>
    %127 = vector.shape_cast %124 : vector<1x64xf32> to vector<1x1x1x64xf32>
    tpu.vector_store %arg11[%c1_106, %c0_107, %c0_108, %c0_109], %127 {strides = array<i32>} : memref<2x2x3x96xf32, #tpu.memory_space<vmem>>, vector<1x1x1x64xf32>,
    %128 = vector.extract_strided_slice %123 {offsets = [1, 0], sizes = [1, 64], strides = [1, 1]} : vector<4x64xf32> to vector<1x64xf32>
    %c0_110 = arith.constant 0 : index
    %c0_111 = arith.constant 0 : index
    %c1_112 = arith.constant 1 : index
    %c0_113 = arith.constant 0 : index
    %129 = vector.load %arg11[%c0_110, %c0_111, %c1_112, %c0_113] : memref<2x2x3x96xf32, #tpu.memory_space<vmem>>, vector<1x1x1x64xf32>
    %130 = vector.shape_cast %129 : vector<1x1x1x64xf32> to vector<1x64xf32>
    %131 = vector.shape_cast %128 : vector<1x64xf32> to vector<1x1x1x64xf32>
    tpu.vector_store %arg11[%c0_110, %c0_111, %c1_112, %c0_113], %131 {strides = array<i32>} : memref<2x2x3x96xf32, #tpu.memory_space<vmem>>, vector<1x1x1x64xf32>,
    %132 = vector.extract_strided_slice %123 {offsets = [2, 0], sizes = [1, 64], strides = [1, 1]} : vector<4x64xf32> to vector<1x64xf32>
    %c1_114 = arith.constant 1 : index
    %c0_115 = arith.constant 0 : index
    %c1_116 = arith.constant 1 : index
    %c0_117 = arith.constant 0 : index
    %133 = vector.load %arg11[%c1_114, %c0_115, %c1_116, %c0_117] : memref<2x2x3x96xf32, #tpu.memory_space<vmem>>, vector<1x1x1x64xf32>
    %134 = vector.shape_cast %133 : vector<1x1x1x64xf32> to vector<1x64xf32>
    %135 = vector.shape_cast %132 : vector<1x64xf32> to vector<1x1x1x64xf32>
    tpu.vector_store %arg11[%c1_114, %c0_115, %c1_116, %c0_117], %135 {strides = array<i32>} : memref<2x2x3x96xf32, #tpu.memory_space<vmem>>, vector<1x1x1x64xf32>,
    %136 = vector.extract_strided_slice %123 {offsets = [3, 0], sizes = [1, 64], strides = [1, 1]} : vector<4x64xf32> to vector<1x64xf32>
    %c0_118 = arith.constant 0 : index
    %c0_119 = arith.constant 0 : index
    %c2_120 = arith.constant 2 : index
    %c0_121 = arith.constant 0 : index
    %137 = vector.load %arg11[%c0_118, %c0_119, %c2_120, %c0_121] : memref<2x2x3x96xf32, #tpu.memory_space<vmem>>, vector<1x1x1x64xf32>
    %138 = vector.shape_cast %137 : vector<1x1x1x64xf32> to vector<1x64xf32>
    %139 = vector.shape_cast %136 : vector<1x64xf32> to vector<1x1x1x64xf32>
    tpu.vector_store %arg11[%c0_118, %c0_119, %c2_120, %c0_121], %139 {strides = array<i32>} : memref<2x2x3x96xf32, #tpu.memory_space<vmem>>, vector<1x1x1x64xf32>,
    %c0_122 = arith.constant 0 : index
    %c0_123 = arith.constant 0 : index
    %c0_124 = arith.constant 0 : index
    %c0_125 = arith.constant 0 : index
    %140 = vector.load %arg11[%c0_122, %c0_123, %c0_124, %c0_125] : memref<2x2x3x96xf32, #tpu.memory_space<vmem>>, vector<1x1x2x96xf32>
    %141 = vector.shape_cast %140 : vector<1x1x2x96xf32> to vector<2x96xf32>
    %142 = arith.truncf %141 : vector<2x96xf32> to vector<2x96xbf16>
    %c1_126 = arith.constant 1 : index
    %c0_127 = arith.constant 0 : index
    %c0_128 = arith.constant 0 : index
    %c0_129 = arith.constant 0 : index
    %143 = vector.load %arg11[%c1_126, %c0_127, %c0_128, %c0_129] : memref<2x2x3x96xf32, #tpu.memory_space<vmem>>, vector<1x1x2x96xf32>
    %144 = vector.shape_cast %143 : vector<1x1x2x96xf32> to vector<2x96xf32>
    %145 = arith.truncf %144 : vector<2x96xf32> to vector<2x96xbf16>
    %c0_130 = arith.constant 0 : index
    %c0_131 = arith.constant 0 : index
    %c1_132 = arith.constant 1 : index
    %c0_133 = arith.constant 0 : index
    %146 = vector.load %arg11[%c0_130, %c0_131, %c1_132, %c0_133] : memref<2x2x3x96xf32, #tpu.memory_space<vmem>>, vector<1x1x2x96xf32>
    %147 = vector.shape_cast %146 : vector<1x1x2x96xf32> to vector<2x96xf32>
    %148 = arith.truncf %147 : vector<2x96xf32> to vector<2x96xbf16>
    %c1_134 = arith.constant 1 : index
    %c0_135 = arith.constant 0 : index
    %c1_136 = arith.constant 1 : index
    %c0_137 = arith.constant 0 : index
    %149 = vector.load %arg11[%c1_134, %c0_135, %c1_136, %c0_137] : memref<2x2x3x96xf32, #tpu.memory_space<vmem>>, vector<1x1x2x96xf32>
    %150 = vector.shape_cast %149 : vector<1x1x2x96xf32> to vector<2x96xf32>
    %151 = arith.truncf %150 : vector<2x96xf32> to vector<2x96xbf16>
    %c0_138 = arith.constant 0 : index
    %c0_139 = arith.constant 0 : index
    %c0_140 = arith.constant 0 : index
    %152 = vector.load %arg5[%c0_138, %c0_139, %c0_140] : memref<3x96x128xbf16, #tpu.memory_space<vmem>>, vector<1x96x128xbf16>
    %153 = vector.shape_cast %152 : vector<1x96x128xbf16> to vector<96x128xbf16>
    %c1_141 = arith.constant 1 : index
    %c0_142 = arith.constant 0 : index
    %c0_143 = arith.constant 0 : index
    %154 = vector.load %arg5[%c1_141, %c0_142, %c0_143] : memref<3x96x128xbf16, #tpu.memory_space<vmem>>, vector<1x96x128xbf16>
    %155 = vector.shape_cast %154 : vector<1x96x128xbf16> to vector<96x128xbf16>
    %c2_144 = arith.constant 2 : index
    %c0_145 = arith.constant 0 : index
    %c0_146 = arith.constant 0 : index
    %156 = vector.load %arg5[%c2_144, %c0_145, %c0_146] : memref<3x96x128xbf16, #tpu.memory_space<vmem>>, vector<1x96x128xbf16>
    %157 = vector.shape_cast %156 : vector<1x96x128xbf16> to vector<96x128xbf16>
    %c0_147 = arith.constant 0 : index
    %c0_148 = arith.constant 0 : index
    %158 = vector.load %arg6[%c0_147, %c0_148] : memref<1x128xf32, #tpu.memory_space<vmem>>, vector<1x128xf32>
    %cst_149 = arith.constant dense<0.000000e+00> : vector<2x128xf32>
    %159 = tpu.matmul %142, %153, %cst_149 {dimension_numbers = #tpu.dot_dimension_numbers<[1], [0], [0], [1], [0, 0, 1, 1], [], []>} : vector<2x96xbf16>, vector<96x128xbf16>, vector<2x128xf32> -> vector<2x128xf32>
    %cst_150 = arith.constant dense<0.000000e+00> : vector<2x128xf32>
    %160 = tpu.matmul %145, %155, %cst_150 {dimension_numbers = #tpu.dot_dimension_numbers<[1], [0], [0], [1], [0, 0, 1, 1], [], []>} : vector<2x96xbf16>, vector<96x128xbf16>, vector<2x128xf32> -> vector<2x128xf32>
    %161 = arith.addf %159, %160 : vector<2x128xf32>
    %cst_151 = arith.constant dense<0.000000e+00> : vector<2x128xf32>
    %162 = tpu.matmul %148, %157, %cst_151 {dimension_numbers = #tpu.dot_dimension_numbers<[1], [0], [0], [1], [0, 0, 1, 1], [], []>} : vector<2x96xbf16>, vector<96x128xbf16>, vector<2x128xf32> -> vector<2x128xf32>
    %163 = arith.addf %161, %162 : vector<2x128xf32>
    %164 = vector.broadcast %158 : vector<1x128xf32> to vector<2x128xf32>
    %165 = arith.addf %163, %164 : vector<2x128xf32>
    %cst_152 = arith.constant dense<0.000000e+00> : vector<2x128xf32>
    %166 = tpu.matmul %145, %153, %cst_152 {dimension_numbers = #tpu.dot_dimension_numbers<[1], [0], [0], [1], [0, 0, 1, 1], [], []>} : vector<2x96xbf16>, vector<96x128xbf16>, vector<2x128xf32> -> vector<2x128xf32>
    %cst_153 = arith.constant dense<0.000000e+00> : vector<2x128xf32>
    %167 = tpu.matmul %148, %155, %cst_153 {dimension_numbers = #tpu.dot_dimension_numbers<[1], [0], [0], [1], [0, 0, 1, 1], [], []>} : vector<2x96xbf16>, vector<96x128xbf16>, vector<2x128xf32> -> vector<2x128xf32>
    %168 = arith.addf %166, %167 : vector<2x128xf32>
    %cst_154 = arith.constant dense<0.000000e+00> : vector<2x128xf32>
    %169 = tpu.matmul %151, %157, %cst_154 {dimension_numbers = #tpu.dot_dimension_numbers<[1], [0], [0], [1], [0, 0, 1, 1], [], []>} : vector<2x96xbf16>, vector<96x128xbf16>, vector<2x128xf32> -> vector<2x128xf32>
    %170 = arith.addf %168, %169 : vector<2x128xf32>
    %171 = vector.broadcast %158 : vector<1x128xf32> to vector<2x128xf32>
    %172 = arith.addf %170, %171 : vector<2x128xf32>
    %cst_155 = arith.constant 0.000000e+00 : f32
    %173 = vector.broadcast %cst_155 : f32 to vector<2x128xf32>
    %174 = arith.maximumf %165, %173 : vector<2x128xf32>
    %cst_156 = arith.constant 0.000000e+00 : f32
    %175 = vector.broadcast %cst_156 : f32 to vector<2x128xf32>
    %176 = arith.maximumf %172, %175 : vector<2x128xf32>
    %177 = vector.extract_strided_slice %174 {offsets = [0, 0], sizes = [2, 64], strides = [1, 1]} : vector<2x128xf32> to vector<2x64xf32>
    %178 = vector.extract_strided_slice %174 {offsets = [0, 64], sizes = [2, 64], strides = [1, 1]} : vector<2x128xf32> to vector<2x64xf32>
    %179 = arith.maximumf %177, %178 : vector<2x64xf32>
    %180 = vector.extract_strided_slice %176 {offsets = [0, 0], sizes = [2, 64], strides = [1, 1]} : vector<2x128xf32> to vector<2x64xf32>
    %181 = vector.extract_strided_slice %176 {offsets = [0, 64], sizes = [2, 64], strides = [1, 1]} : vector<2x128xf32> to vector<2x64xf32>
    %182 = arith.maximumf %180, %181 : vector<2x64xf32>
    %183 = arith.maximumf %179, %182 : vector<2x64xf32>
    %c0_157 = arith.constant 0 : index
    %c0_158 = arith.constant 0 : index
    %184 = vector.load %arg8[%c0_157, %c0_158] : memref<1x32xf32, #tpu.memory_space<vmem>>, vector<1x32xf32>
    %185 = vector.extract_strided_slice %183 {offsets = [0, 0], sizes = [1, 64], strides = [1, 1]} : vector<2x64xf32> to vector<1x64xf32>
    %186 = arith.truncf %185 : vector<1x64xf32> to vector<1x64xbf16>
    %c0_159 = arith.constant 0 : index
    %c0_160 = arith.constant 0 : index
    %c0_161 = arith.constant 0 : index
    %187 = vector.load %arg7[%c0_159, %c0_160, %c0_161] : memref<2x64x32xbf16, #tpu.memory_space<vmem>>, vector<1x64x32xbf16>
    %188 = vector.shape_cast %187 : vector<1x64x32xbf16> to vector<64x32xbf16>
    %cst_162 = arith.constant dense<0.000000e+00> : vector<1x32xf32>
    %189 = tpu.matmul %186, %188, %cst_162 {dimension_numbers = #tpu.dot_dimension_numbers<[1], [0], [0], [1], [0, 0, 1, 1], [], []>} : vector<1x64xbf16>, vector<64x32xbf16>, vector<1x32xf32> -> vector<1x32xf32>
    %190 = arith.addf %184, %189 : vector<1x32xf32>
    %191 = vector.extract_strided_slice %183 {offsets = [1, 0], sizes = [1, 64], strides = [1, 1]} : vector<2x64xf32> to vector<1x64xf32>
    %192 = arith.truncf %191 : vector<1x64xf32> to vector<1x64xbf16>
    %c1_163 = arith.constant 1 : index
    %c0_164 = arith.constant 0 : index
    %c0_165 = arith.constant 0 : index
    %193 = vector.load %arg7[%c1_163, %c0_164, %c0_165] : memref<2x64x32xbf16, #tpu.memory_space<vmem>>, vector<1x64x32xbf16>
    %194 = vector.shape_cast %193 : vector<1x64x32xbf16> to vector<64x32xbf16>
    %cst_166 = arith.constant dense<0.000000e+00> : vector<1x32xf32>
    %195 = tpu.matmul %192, %194, %cst_166 {dimension_numbers = #tpu.dot_dimension_numbers<[1], [0], [0], [1], [0, 0, 1, 1], [], []>} : vector<1x64xbf16>, vector<64x32xbf16>, vector<1x32xf32> -> vector<1x32xf32>
    %196 = arith.addf %190, %195 : vector<1x32xf32>
    %c0_167 = arith.constant 0 : index
    %c0_168 = arith.constant 0 : index
    %197 = vector.load %arg9[%c0_167, %c0_168] : memref<2x32xf32, #tpu.memory_space<vmem>>, vector<1x32xf32>
    tpu.vector_store %arg9[%c0_167, %c0_168], %196 {strides = array<i32>} : memref<2x32xf32, #tpu.memory_space<vmem>>, vector<1x32xf32>,
    %c0_169 = arith.constant 0 : index
    %c1_170 = arith.constant 1 : index
    %c0_171 = arith.constant 0 : index
    %c0_172 = arith.constant 0 : index
    %198 = vector.load %arg0[%c0_169, %c1_170, %c0_171, %c0_172] : memref<2x2x9x144xf32, #tpu.memory_space<vmem>>, vector<1x1x8x144xf32>
    %199 = vector.shape_cast %198 : vector<1x1x8x144xf32> to vector<8x144xf32>
    %200 = arith.truncf %199 : vector<8x144xf32> to vector<8x144xbf16>
    %c1_173 = arith.constant 1 : index
    %c1_174 = arith.constant 1 : index
    %c0_175 = arith.constant 0 : index
    %c0_176 = arith.constant 0 : index
    %201 = vector.load %arg0[%c1_173, %c1_174, %c0_175, %c0_176] : memref<2x2x9x144xf32, #tpu.memory_space<vmem>>, vector<1x1x8x144xf32>
    %202 = vector.shape_cast %201 : vector<1x1x8x144xf32> to vector<8x144xf32>
    %203 = arith.truncf %202 : vector<8x144xf32> to vector<8x144xbf16>
    %c0_177 = arith.constant 0 : index
    %c1_178 = arith.constant 1 : index
    %c1_179 = arith.constant 1 : index
    %c0_180 = arith.constant 0 : index
    %204 = vector.load %arg0[%c0_177, %c1_178, %c1_179, %c0_180] : memref<2x2x9x144xf32, #tpu.memory_space<vmem>>, vector<1x1x8x144xf32>
    %205 = vector.shape_cast %204 : vector<1x1x8x144xf32> to vector<8x144xf32>
    %206 = arith.truncf %205 : vector<8x144xf32> to vector<8x144xbf16>
    %c1_181 = arith.constant 1 : index
    %c1_182 = arith.constant 1 : index
    %c1_183 = arith.constant 1 : index
    %c0_184 = arith.constant 0 : index
    %207 = vector.load %arg0[%c1_181, %c1_182, %c1_183, %c0_184] : memref<2x2x9x144xf32, #tpu.memory_space<vmem>>, vector<1x1x8x144xf32>
    %208 = vector.shape_cast %207 : vector<1x1x8x144xf32> to vector<8x144xf32>
    %209 = arith.truncf %208 : vector<8x144xf32> to vector<8x144xbf16>
    %c0_185 = arith.constant 0 : index
    %c0_186 = arith.constant 0 : index
    %c0_187 = arith.constant 0 : index
    %210 = vector.load %arg1[%c0_185, %c0_186, %c0_187] : memref<3x144x128xbf16, #tpu.memory_space<vmem>>, vector<1x144x128xbf16>
    %211 = vector.shape_cast %210 : vector<1x144x128xbf16> to vector<144x128xbf16>
    %c1_188 = arith.constant 1 : index
    %c0_189 = arith.constant 0 : index
    %c0_190 = arith.constant 0 : index
    %212 = vector.load %arg1[%c1_188, %c0_189, %c0_190] : memref<3x144x128xbf16, #tpu.memory_space<vmem>>, vector<1x144x128xbf16>
    %213 = vector.shape_cast %212 : vector<1x144x128xbf16> to vector<144x128xbf16>
    %c2_191 = arith.constant 2 : index
    %c0_192 = arith.constant 0 : index
    %c0_193 = arith.constant 0 : index
    %214 = vector.load %arg1[%c2_191, %c0_192, %c0_193] : memref<3x144x128xbf16, #tpu.memory_space<vmem>>, vector<1x144x128xbf16>
    %215 = vector.shape_cast %214 : vector<1x144x128xbf16> to vector<144x128xbf16>
    %c0_194 = arith.constant 0 : index
    %c0_195 = arith.constant 0 : index
    %216 = vector.load %arg2[%c0_194, %c0_195] : memref<1x128xf32, #tpu.memory_space<vmem>>, vector<1x128xf32>
    %cst_196 = arith.constant dense<0.000000e+00> : vector<8x128xf32>
    %217 = tpu.matmul %200, %211, %cst_196 {dimension_numbers = #tpu.dot_dimension_numbers<[1], [0], [0], [1], [0, 0, 1, 1], [], []>} : vector<8x144xbf16>, vector<144x128xbf16>, vector<8x128xf32> -> vector<8x128xf32>
    %cst_197 = arith.constant dense<0.000000e+00> : vector<8x128xf32>
    %218 = tpu.matmul %203, %213, %cst_197 {dimension_numbers = #tpu.dot_dimension_numbers<[1], [0], [0], [1], [0, 0, 1, 1], [], []>} : vector<8x144xbf16>, vector<144x128xbf16>, vector<8x128xf32> -> vector<8x128xf32>
    %219 = arith.addf %217, %218 : vector<8x128xf32>
    %cst_198 = arith.constant dense<0.000000e+00> : vector<8x128xf32>
    %220 = tpu.matmul %206, %215, %cst_198 {dimension_numbers = #tpu.dot_dimension_numbers<[1], [0], [0], [1], [0, 0, 1, 1], [], []>} : vector<8x144xbf16>, vector<144x128xbf16>, vector<8x128xf32> -> vector<8x128xf32>
    %221 = arith.addf %219, %220 : vector<8x128xf32>
    %222 = vector.broadcast %216 : vector<1x128xf32> to vector<8x128xf32>
    %223 = arith.addf %221, %222 : vector<8x128xf32>
    %cst_199 = arith.constant dense<0.000000e+00> : vector<8x128xf32>
    %224 = tpu.matmul %203, %211, %cst_199 {dimension_numbers = #tpu.dot_dimension_numbers<[1], [0], [0], [1], [0, 0, 1, 1], [], []>} : vector<8x144xbf16>, vector<144x128xbf16>, vector<8x128xf32> -> vector<8x128xf32>
    %cst_200 = arith.constant dense<0.000000e+00> : vector<8x128xf32>
    %225 = tpu.matmul %206, %213, %cst_200 {dimension_numbers = #tpu.dot_dimension_numbers<[1], [0], [0], [1], [0, 0, 1, 1], [], []>} : vector<8x144xbf16>, vector<144x128xbf16>, vector<8x128xf32> -> vector<8x128xf32>
    %226 = arith.addf %224, %225 : vector<8x128xf32>
    %cst_201 = arith.constant dense<0.000000e+00> : vector<8x128xf32>
    %227 = tpu.matmul %209, %215, %cst_201 {dimension_numbers = #tpu.dot_dimension_numbers<[1], [0], [0], [1], [0, 0, 1, 1], [], []>} : vector<8x144xbf16>, vector<144x128xbf16>, vector<8x128xf32> -> vector<8x128xf32>
    %228 = arith.addf %226, %227 : vector<8x128xf32>
    %229 = vector.broadcast %216 : vector<1x128xf32> to vector<8x128xf32>
    %230 = arith.addf %228, %229 : vector<8x128xf32>
    %cst_202 = arith.constant 0.000000e+00 : f32
    %231 = vector.broadcast %cst_202 : f32 to vector<8x128xf32>
    %232 = arith.maximumf %223, %231 : vector<8x128xf32>
    %cst_203 = arith.constant 0.000000e+00 : f32
    %233 = vector.broadcast %cst_203 : f32 to vector<8x128xf32>
    %234 = arith.maximumf %230, %233 : vector<8x128xf32>
    %235 = vector.extract_strided_slice %232 {offsets = [0, 0], sizes = [8, 64], strides = [1, 1]} : vector<8x128xf32> to vector<8x64xf32>
    %236 = vector.extract_strided_slice %232 {offsets = [0, 64], sizes = [8, 64], strides = [1, 1]} : vector<8x128xf32> to vector<8x64xf32>
    %237 = arith.maximumf %235, %236 : vector<8x64xf32>
    %238 = vector.extract_strided_slice %234 {offsets = [0, 0], sizes = [8, 64], strides = [1, 1]} : vector<8x128xf32> to vector<8x64xf32>
    %239 = vector.extract_strided_slice %234 {offsets = [0, 64], sizes = [8, 64], strides = [1, 1]} : vector<8x128xf32> to vector<8x64xf32>
    %240 = arith.maximumf %238, %239 : vector<8x64xf32>
    %241 = arith.maximumf %237, %240 : vector<8x64xf32>
    %242 = vector.extract_strided_slice %241 {offsets = [0, 0], sizes = [1, 64], strides = [1, 1]} : vector<8x64xf32> to vector<1x64xf32>
    %c1_204 = arith.constant 1 : index
    %c1_205 = arith.constant 1 : index
    %c0_206 = arith.constant 0 : index
    %c0_207 = arith.constant 0 : index
    %243 = vector.load %arg10[%c1_204, %c1_205, %c0_206, %c0_207] : memref<2x2x5x80xf32, #tpu.memory_space<vmem>>, vector<1x1x1x64xf32>
    %244 = vector.shape_cast %243 : vector<1x1x1x64xf32> to vector<1x64xf32>
    %245 = vector.shape_cast %242 : vector<1x64xf32> to vector<1x1x1x64xf32>
    tpu.vector_store %arg10[%c1_204, %c1_205, %c0_206, %c0_207], %245 {strides = array<i32>} : memref<2x2x5x80xf32, #tpu.memory_space<vmem>>, vector<1x1x1x64xf32>,
    %246 = vector.extract_strided_slice %241 {offsets = [1, 0], sizes = [1, 64], strides = [1, 1]} : vector<8x64xf32> to vector<1x64xf32>
    %c0_208 = arith.constant 0 : index
    %c1_209 = arith.constant 1 : index
    %c1_210 = arith.constant 1 : index
    %c0_211 = arith.constant 0 : index
    %247 = vector.load %arg10[%c0_208, %c1_209, %c1_210, %c0_211] : memref<2x2x5x80xf32, #tpu.memory_space<vmem>>, vector<1x1x1x64xf32>
    %248 = vector.shape_cast %247 : vector<1x1x1x64xf32> to vector<1x64xf32>
    %249 = vector.shape_cast %246 : vector<1x64xf32> to vector<1x1x1x64xf32>
    tpu.vector_store %arg10[%c0_208, %c1_209, %c1_210, %c0_211], %249 {strides = array<i32>} : memref<2x2x5x80xf32, #tpu.memory_space<vmem>>, vector<1x1x1x64xf32>,
    %250 = vector.extract_strided_slice %241 {offsets = [2, 0], sizes = [1, 64], strides = [1, 1]} : vector<8x64xf32> to vector<1x64xf32>
    %c1_212 = arith.constant 1 : index
    %c1_213 = arith.constant 1 : index
    %c1_214 = arith.constant 1 : index
    %c0_215 = arith.constant 0 : index
    %251 = vector.load %arg10[%c1_212, %c1_213, %c1_214, %c0_215] : memref<2x2x5x80xf32, #tpu.memory_space<vmem>>, vector<1x1x1x64xf32>
    %252 = vector.shape_cast %251 : vector<1x1x1x64xf32> to vector<1x64xf32>
    %253 = vector.shape_cast %250 : vector<1x64xf32> to vector<1x1x1x64xf32>
    tpu.vector_store %arg10[%c1_212, %c1_213, %c1_214, %c0_215], %253 {strides = array<i32>} : memref<2x2x5x80xf32, #tpu.memory_space<vmem>>, vector<1x1x1x64xf32>,
    %254 = vector.extract_strided_slice %241 {offsets = [3, 0], sizes = [1, 64], strides = [1, 1]} : vector<8x64xf32> to vector<1x64xf32>
    %c0_216 = arith.constant 0 : index
    %c1_217 = arith.constant 1 : index
    %c2_218 = arith.constant 2 : index
    %c0_219 = arith.constant 0 : index
    %255 = vector.load %arg10[%c0_216, %c1_217, %c2_218, %c0_219] : memref<2x2x5x80xf32, #tpu.memory_space<vmem>>, vector<1x1x1x64xf32>
    %256 = vector.shape_cast %255 : vector<1x1x1x64xf32> to vector<1x64xf32>
    %257 = vector.shape_cast %254 : vector<1x64xf32> to vector<1x1x1x64xf32>
    tpu.vector_store %arg10[%c0_216, %c1_217, %c2_218, %c0_219], %257 {strides = array<i32>} : memref<2x2x5x80xf32, #tpu.memory_space<vmem>>, vector<1x1x1x64xf32>,
    %258 = vector.extract_strided_slice %241 {offsets = [4, 0], sizes = [1, 64], strides = [1, 1]} : vector<8x64xf32> to vector<1x64xf32>
    %c1_220 = arith.constant 1 : index
    %c1_221 = arith.constant 1 : index
    %c2_222 = arith.constant 2 : index
    %c0_223 = arith.constant 0 : index
    %259 = vector.load %arg10[%c1_220, %c1_221, %c2_222, %c0_223] : memref<2x2x5x80xf32, #tpu.memory_space<vmem>>, vector<1x1x1x64xf32>
    %260 = vector.shape_cast %259 : vector<1x1x1x64xf32> to vector<1x64xf32>
    %261 = vector.shape_cast %258 : vector<1x64xf32> to vector<1x1x1x64xf32>
    tpu.vector_store %arg10[%c1_220, %c1_221, %c2_222, %c0_223], %261 {strides = array<i32>} : memref<2x2x5x80xf32, #tpu.memory_space<vmem>>, vector<1x1x1x64xf32>,
    %262 = vector.extract_strided_slice %241 {offsets = [5, 0], sizes = [1, 64], strides = [1, 1]} : vector<8x64xf32> to vector<1x64xf32>
    %c0_224 = arith.constant 0 : index
    %c1_225 = arith.constant 1 : index
    %c3_226 = arith.constant 3 : index
    %c0_227 = arith.constant 0 : index
    %263 = vector.load %arg10[%c0_224, %c1_225, %c3_226, %c0_227] : memref<2x2x5x80xf32, #tpu.memory_space<vmem>>, vector<1x1x1x64xf32>
    %264 = vector.shape_cast %263 : vector<1x1x1x64xf32> to vector<1x64xf32>
    %265 = vector.shape_cast %262 : vector<1x64xf32> to vector<1x1x1x64xf32>
    tpu.vector_store %arg10[%c0_224, %c1_225, %c3_226, %c0_227], %265 {strides = array<i32>} : memref<2x2x5x80xf32, #tpu.memory_space<vmem>>, vector<1x1x1x64xf32>,
    %266 = vector.extract_strided_slice %241 {offsets = [6, 0], sizes = [1, 64], strides = [1, 1]} : vector<8x64xf32> to vector<1x64xf32>
    %c1_228 = arith.constant 1 : index
    %c1_229 = arith.constant 1 : index
    %c3_230 = arith.constant 3 : index
    %c0_231 = arith.constant 0 : index
    %267 = vector.load %arg10[%c1_228, %c1_229, %c3_230, %c0_231] : memref<2x2x5x80xf32, #tpu.memory_space<vmem>>, vector<1x1x1x64xf32>
    %268 = vector.shape_cast %267 : vector<1x1x1x64xf32> to vector<1x64xf32>
    %269 = vector.shape_cast %266 : vector<1x64xf32> to vector<1x1x1x64xf32>
    tpu.vector_store %arg10[%c1_228, %c1_229, %c3_230, %c0_231], %269 {strides = array<i32>} : memref<2x2x5x80xf32, #tpu.memory_space<vmem>>, vector<1x1x1x64xf32>,
    %270 = vector.extract_strided_slice %241 {offsets = [7, 0], sizes = [1, 64], strides = [1, 1]} : vector<8x64xf32> to vector<1x64xf32>
    %c0_232 = arith.constant 0 : index
    %c1_233 = arith.constant 1 : index
    %c4_234 = arith.constant 4 : index
    %c0_235 = arith.constant 0 : index
    %271 = vector.load %arg10[%c0_232, %c1_233, %c4_234, %c0_235] : memref<2x2x5x80xf32, #tpu.memory_space<vmem>>, vector<1x1x1x64xf32>
    %272 = vector.shape_cast %271 : vector<1x1x1x64xf32> to vector<1x64xf32>
    %273 = vector.shape_cast %270 : vector<1x64xf32> to vector<1x1x1x64xf32>
    tpu.vector_store %arg10[%c0_232, %c1_233, %c4_234, %c0_235], %273 {strides = array<i32>} : memref<2x2x5x80xf32, #tpu.memory_space<vmem>>, vector<1x1x1x64xf32>,
    %c0_236 = arith.constant 0 : index
    %c1_237 = arith.constant 1 : index
    %c0_238 = arith.constant 0 : index
    %c0_239 = arith.constant 0 : index
    %274 = vector.load %arg10[%c0_236, %c1_237, %c0_238, %c0_239] : memref<2x2x5x80xf32, #tpu.memory_space<vmem>>, vector<1x1x4x80xf32>
    %275 = vector.shape_cast %274 : vector<1x1x4x80xf32> to vector<4x80xf32>
    %276 = arith.truncf %275 : vector<4x80xf32> to vector<4x80xbf16>
    %c1_240 = arith.constant 1 : index
    %c1_241 = arith.constant 1 : index
    %c0_242 = arith.constant 0 : index
    %c0_243 = arith.constant 0 : index
    %277 = vector.load %arg10[%c1_240, %c1_241, %c0_242, %c0_243] : memref<2x2x5x80xf32, #tpu.memory_space<vmem>>, vector<1x1x4x80xf32>
    %278 = vector.shape_cast %277 : vector<1x1x4x80xf32> to vector<4x80xf32>
    %279 = arith.truncf %278 : vector<4x80xf32> to vector<4x80xbf16>
    %c0_244 = arith.constant 0 : index
    %c1_245 = arith.constant 1 : index
    %c1_246 = arith.constant 1 : index
    %c0_247 = arith.constant 0 : index
    %280 = vector.load %arg10[%c0_244, %c1_245, %c1_246, %c0_247] : memref<2x2x5x80xf32, #tpu.memory_space<vmem>>, vector<1x1x4x80xf32>
    %281 = vector.shape_cast %280 : vector<1x1x4x80xf32> to vector<4x80xf32>
    %282 = arith.truncf %281 : vector<4x80xf32> to vector<4x80xbf16>
    %c1_248 = arith.constant 1 : index
    %c1_249 = arith.constant 1 : index
    %c1_250 = arith.constant 1 : index
    %c0_251 = arith.constant 0 : index
    %283 = vector.load %arg10[%c1_248, %c1_249, %c1_250, %c0_251] : memref<2x2x5x80xf32, #tpu.memory_space<vmem>>, vector<1x1x4x80xf32>
    %284 = vector.shape_cast %283 : vector<1x1x4x80xf32> to vector<4x80xf32>
    %285 = arith.truncf %284 : vector<4x80xf32> to vector<4x80xbf16>
    %c0_252 = arith.constant 0 : index
    %c0_253 = arith.constant 0 : index
    %c0_254 = arith.constant 0 : index
    %286 = vector.load %arg3[%c0_252, %c0_253, %c0_254] : memref<3x80x128xbf16, #tpu.memory_space<vmem>>, vector<1x80x128xbf16>
    %287 = vector.shape_cast %286 : vector<1x80x128xbf16> to vector<80x128xbf16>
    %c1_255 = arith.constant 1 : index
    %c0_256 = arith.constant 0 : index
    %c0_257 = arith.constant 0 : index
    %288 = vector.load %arg3[%c1_255, %c0_256, %c0_257] : memref<3x80x128xbf16, #tpu.memory_space<vmem>>, vector<1x80x128xbf16>
    %289 = vector.shape_cast %288 : vector<1x80x128xbf16> to vector<80x128xbf16>
    %c2_258 = arith.constant 2 : index
    %c0_259 = arith.constant 0 : index
    %c0_260 = arith.constant 0 : index
    %290 = vector.load %arg3[%c2_258, %c0_259, %c0_260] : memref<3x80x128xbf16, #tpu.memory_space<vmem>>, vector<1x80x128xbf16>
    %291 = vector.shape_cast %290 : vector<1x80x128xbf16> to vector<80x128xbf16>
    %c0_261 = arith.constant 0 : index
    %c0_262 = arith.constant 0 : index
    %292 = vector.load %arg4[%c0_261, %c0_262] : memref<1x128xf32, #tpu.memory_space<vmem>>, vector<1x128xf32>
    %cst_263 = arith.constant dense<0.000000e+00> : vector<4x128xf32>
    %293 = tpu.matmul %276, %287, %cst_263 {dimension_numbers = #tpu.dot_dimension_numbers<[1], [0], [0], [1], [0, 0, 1, 1], [], []>} : vector<4x80xbf16>, vector<80x128xbf16>, vector<4x128xf32> -> vector<4x128xf32>
    %cst_264 = arith.constant dense<0.000000e+00> : vector<4x128xf32>
    %294 = tpu.matmul %279, %289, %cst_264 {dimension_numbers = #tpu.dot_dimension_numbers<[1], [0], [0], [1], [0, 0, 1, 1], [], []>} : vector<4x80xbf16>, vector<80x128xbf16>, vector<4x128xf32> -> vector<4x128xf32>
    %295 = arith.addf %293, %294 : vector<4x128xf32>
    %cst_265 = arith.constant dense<0.000000e+00> : vector<4x128xf32>
    %296 = tpu.matmul %282, %291, %cst_265 {dimension_numbers = #tpu.dot_dimension_numbers<[1], [0], [0], [1], [0, 0, 1, 1], [], []>} : vector<4x80xbf16>, vector<80x128xbf16>, vector<4x128xf32> -> vector<4x128xf32>
    %297 = arith.addf %295, %296 : vector<4x128xf32>
    %298 = vector.broadcast %292 : vector<1x128xf32> to vector<4x128xf32>
    %299 = arith.addf %297, %298 : vector<4x128xf32>
    %cst_266 = arith.constant dense<0.000000e+00> : vector<4x128xf32>
    %300 = tpu.matmul %279, %287, %cst_266 {dimension_numbers = #tpu.dot_dimension_numbers<[1], [0], [0], [1], [0, 0, 1, 1], [], []>} : vector<4x80xbf16>, vector<80x128xbf16>, vector<4x128xf32> -> vector<4x128xf32>
    %cst_267 = arith.constant dense<0.000000e+00> : vector<4x128xf32>
    %301 = tpu.matmul %282, %289, %cst_267 {dimension_numbers = #tpu.dot_dimension_numbers<[1], [0], [0], [1], [0, 0, 1, 1], [], []>} : vector<4x80xbf16>, vector<80x128xbf16>, vector<4x128xf32> -> vector<4x128xf32>
    %302 = arith.addf %300, %301 : vector<4x128xf32>
    %cst_268 = arith.constant dense<0.000000e+00> : vector<4x128xf32>
    %303 = tpu.matmul %285, %291, %cst_268 {dimension_numbers = #tpu.dot_dimension_numbers<[1], [0], [0], [1], [0, 0, 1, 1], [], []>} : vector<4x80xbf16>, vector<80x128xbf16>, vector<4x128xf32> -> vector<4x128xf32>
    %304 = arith.addf %302, %303 : vector<4x128xf32>
    %305 = vector.broadcast %292 : vector<1x128xf32> to vector<4x128xf32>
    %306 = arith.addf %304, %305 : vector<4x128xf32>
    %cst_269 = arith.constant 0.000000e+00 : f32
    %307 = vector.broadcast %cst_269 : f32 to vector<4x128xf32>
    %308 = arith.maximumf %299, %307 : vector<4x128xf32>
    %cst_270 = arith.constant 0.000000e+00 : f32
    %309 = vector.broadcast %cst_270 : f32 to vector<4x128xf32>
    %310 = arith.maximumf %306, %309 : vector<4x128xf32>
    %311 = vector.extract_strided_slice %308 {offsets = [0, 0], sizes = [4, 64], strides = [1, 1]} : vector<4x128xf32> to vector<4x64xf32>
    %312 = vector.extract_strided_slice %308 {offsets = [0, 64], sizes = [4, 64], strides = [1, 1]} : vector<4x128xf32> to vector<4x64xf32>
    %313 = arith.maximumf %311, %312 : vector<4x64xf32>
    %314 = vector.extract_strided_slice %310 {offsets = [0, 0], sizes = [4, 64], strides = [1, 1]} : vector<4x128xf32> to vector<4x64xf32>
    %315 = vector.extract_strided_slice %310 {offsets = [0, 64], sizes = [4, 64], strides = [1, 1]} : vector<4x128xf32> to vector<4x64xf32>
    %316 = arith.maximumf %314, %315 : vector<4x64xf32>
    %317 = arith.maximumf %313, %316 : vector<4x64xf32>
    %318 = vector.extract_strided_slice %317 {offsets = [0, 0], sizes = [1, 64], strides = [1, 1]} : vector<4x64xf32> to vector<1x64xf32>
    %c1_271 = arith.constant 1 : index
    %c1_272 = arith.constant 1 : index
    %c0_273 = arith.constant 0 : index
    %c0_274 = arith.constant 0 : index
    %319 = vector.load %arg11[%c1_271, %c1_272, %c0_273, %c0_274] : memref<2x2x3x96xf32, #tpu.memory_space<vmem>>, vector<1x1x1x64xf32>
    %320 = vector.shape_cast %319 : vector<1x1x1x64xf32> to vector<1x64xf32>
    %321 = vector.shape_cast %318 : vector<1x64xf32> to vector<1x1x1x64xf32>
    tpu.vector_store %arg11[%c1_271, %c1_272, %c0_273, %c0_274], %321 {strides = array<i32>} : memref<2x2x3x96xf32, #tpu.memory_space<vmem>>, vector<1x1x1x64xf32>,
    %322 = vector.extract_strided_slice %317 {offsets = [1, 0], sizes = [1, 64], strides = [1, 1]} : vector<4x64xf32> to vector<1x64xf32>
    %c0_275 = arith.constant 0 : index
    %c1_276 = arith.constant 1 : index
    %c1_277 = arith.constant 1 : index
    %c0_278 = arith.constant 0 : index
    %323 = vector.load %arg11[%c0_275, %c1_276, %c1_277, %c0_278] : memref<2x2x3x96xf32, #tpu.memory_space<vmem>>, vector<1x1x1x64xf32>
    %324 = vector.shape_cast %323 : vector<1x1x1x64xf32> to vector<1x64xf32>
    %325 = vector.shape_cast %322 : vector<1x64xf32> to vector<1x1x1x64xf32>
    tpu.vector_store %arg11[%c0_275, %c1_276, %c1_277, %c0_278], %325 {strides = array<i32>} : memref<2x2x3x96xf32, #tpu.memory_space<vmem>>, vector<1x1x1x64xf32>,
    %326 = vector.extract_strided_slice %317 {offsets = [2, 0], sizes = [1, 64], strides = [1, 1]} : vector<4x64xf32> to vector<1x64xf32>
    %c1_279 = arith.constant 1 : index
    %c1_280 = arith.constant 1 : index
    %c1_281 = arith.constant 1 : index
    %c0_282 = arith.constant 0 : index
    %327 = vector.load %arg11[%c1_279, %c1_280, %c1_281, %c0_282] : memref<2x2x3x96xf32, #tpu.memory_space<vmem>>, vector<1x1x1x64xf32>
    %328 = vector.shape_cast %327 : vector<1x1x1x64xf32> to vector<1x64xf32>
    %329 = vector.shape_cast %326 : vector<1x64xf32> to vector<1x1x1x64xf32>
    tpu.vector_store %arg11[%c1_279, %c1_280, %c1_281, %c0_282], %329 {strides = array<i32>} : memref<2x2x3x96xf32, #tpu.memory_space<vmem>>, vector<1x1x1x64xf32>,
    %330 = vector.extract_strided_slice %317 {offsets = [3, 0], sizes = [1, 64], strides = [1, 1]} : vector<4x64xf32> to vector<1x64xf32>
    %c0_283 = arith.constant 0 : index
    %c1_284 = arith.constant 1 : index
    %c2_285 = arith.constant 2 : index
    %c0_286 = arith.constant 0 : index
    %331 = vector.load %arg11[%c0_283, %c1_284, %c2_285, %c0_286] : memref<2x2x3x96xf32, #tpu.memory_space<vmem>>, vector<1x1x1x64xf32>
    %332 = vector.shape_cast %331 : vector<1x1x1x64xf32> to vector<1x64xf32>
    %333 = vector.shape_cast %330 : vector<1x64xf32> to vector<1x1x1x64xf32>
    tpu.vector_store %arg11[%c0_283, %c1_284, %c2_285, %c0_286], %333 {strides = array<i32>} : memref<2x2x3x96xf32, #tpu.memory_space<vmem>>, vector<1x1x1x64xf32>,
    %c0_287 = arith.constant 0 : index
    %c1_288 = arith.constant 1 : index
    %c0_289 = arith.constant 0 : index
    %c0_290 = arith.constant 0 : index
    %334 = vector.load %arg11[%c0_287, %c1_288, %c0_289, %c0_290] : memref<2x2x3x96xf32, #tpu.memory_space<vmem>>, vector<1x1x2x96xf32>
    %335 = vector.shape_cast %334 : vector<1x1x2x96xf32> to vector<2x96xf32>
    %336 = arith.truncf %335 : vector<2x96xf32> to vector<2x96xbf16>
    %c1_291 = arith.constant 1 : index
    %c1_292 = arith.constant 1 : index
    %c0_293 = arith.constant 0 : index
    %c0_294 = arith.constant 0 : index
    %337 = vector.load %arg11[%c1_291, %c1_292, %c0_293, %c0_294] : memref<2x2x3x96xf32, #tpu.memory_space<vmem>>, vector<1x1x2x96xf32>
    %338 = vector.shape_cast %337 : vector<1x1x2x96xf32> to vector<2x96xf32>
    %339 = arith.truncf %338 : vector<2x96xf32> to vector<2x96xbf16>
    %c0_295 = arith.constant 0 : index
    %c1_296 = arith.constant 1 : index
    %c1_297 = arith.constant 1 : index
    %c0_298 = arith.constant 0 : index
    %340 = vector.load %arg11[%c0_295, %c1_296, %c1_297, %c0_298] : memref<2x2x3x96xf32, #tpu.memory_space<vmem>>, vector<1x1x2x96xf32>
    %341 = vector.shape_cast %340 : vector<1x1x2x96xf32> to vector<2x96xf32>
    %342 = arith.truncf %341 : vector<2x96xf32> to vector<2x96xbf16>
    %c1_299 = arith.constant 1 : index
    %c1_300 = arith.constant 1 : index
    %c1_301 = arith.constant 1 : index
    %c0_302 = arith.constant 0 : index
    %343 = vector.load %arg11[%c1_299, %c1_300, %c1_301, %c0_302] : memref<2x2x3x96xf32, #tpu.memory_space<vmem>>, vector<1x1x2x96xf32>
    %344 = vector.shape_cast %343 : vector<1x1x2x96xf32> to vector<2x96xf32>
    %345 = arith.truncf %344 : vector<2x96xf32> to vector<2x96xbf16>
    %c0_303 = arith.constant 0 : index
    %c0_304 = arith.constant 0 : index
    %c0_305 = arith.constant 0 : index
    %346 = vector.load %arg5[%c0_303, %c0_304, %c0_305] : memref<3x96x128xbf16, #tpu.memory_space<vmem>>, vector<1x96x128xbf16>
    %347 = vector.shape_cast %346 : vector<1x96x128xbf16> to vector<96x128xbf16>
    %c1_306 = arith.constant 1 : index
    %c0_307 = arith.constant 0 : index
    %c0_308 = arith.constant 0 : index
    %348 = vector.load %arg5[%c1_306, %c0_307, %c0_308] : memref<3x96x128xbf16, #tpu.memory_space<vmem>>, vector<1x96x128xbf16>
    %349 = vector.shape_cast %348 : vector<1x96x128xbf16> to vector<96x128xbf16>
    %c2_309 = arith.constant 2 : index
    %c0_310 = arith.constant 0 : index
    %c0_311 = arith.constant 0 : index
    %350 = vector.load %arg5[%c2_309, %c0_310, %c0_311] : memref<3x96x128xbf16, #tpu.memory_space<vmem>>, vector<1x96x128xbf16>
    %351 = vector.shape_cast %350 : vector<1x96x128xbf16> to vector<96x128xbf16>
    %c0_312 = arith.constant 0 : index
    %c0_313 = arith.constant 0 : index
    %352 = vector.load %arg6[%c0_312, %c0_313] : memref<1x128xf32, #tpu.memory_space<vmem>>, vector<1x128xf32>
    %cst_314 = arith.constant dense<0.000000e+00> : vector<2x128xf32>
    %353 = tpu.matmul %336, %347, %cst_314 {dimension_numbers = #tpu.dot_dimension_numbers<[1], [0], [0], [1], [0, 0, 1, 1], [], []>} : vector<2x96xbf16>, vector<96x128xbf16>, vector<2x128xf32> -> vector<2x128xf32>
    %cst_315 = arith.constant dense<0.000000e+00> : vector<2x128xf32>
    %354 = tpu.matmul %339, %349, %cst_315 {dimension_numbers = #tpu.dot_dimension_numbers<[1], [0], [0], [1], [0, 0, 1, 1], [], []>} : vector<2x96xbf16>, vector<96x128xbf16>, vector<2x128xf32> -> vector<2x128xf32>
    %355 = arith.addf %353, %354 : vector<2x128xf32>
    %cst_316 = arith.constant dense<0.000000e+00> : vector<2x128xf32>
    %356 = tpu.matmul %342, %351, %cst_316 {dimension_numbers = #tpu.dot_dimension_numbers<[1], [0], [0], [1], [0, 0, 1, 1], [], []>} : vector<2x96xbf16>, vector<96x128xbf16>, vector<2x128xf32> -> vector<2x128xf32>
    %357 = arith.addf %355, %356 : vector<2x128xf32>
    %358 = vector.broadcast %352 : vector<1x128xf32> to vector<2x128xf32>
    %359 = arith.addf %357, %358 : vector<2x128xf32>
    %cst_317 = arith.constant dense<0.000000e+00> : vector<2x128xf32>
    %360 = tpu.matmul %339, %347, %cst_317 {dimension_numbers = #tpu.dot_dimension_numbers<[1], [0], [0], [1], [0, 0, 1, 1], [], []>} : vector<2x96xbf16>, vector<96x128xbf16>, vector<2x128xf32> -> vector<2x128xf32>
    %cst_318 = arith.constant dense<0.000000e+00> : vector<2x128xf32>
    %361 = tpu.matmul %342, %349, %cst_318 {dimension_numbers = #tpu.dot_dimension_numbers<[1], [0], [0], [1], [0, 0, 1, 1], [], []>} : vector<2x96xbf16>, vector<96x128xbf16>, vector<2x128xf32> -> vector<2x128xf32>
    %362 = arith.addf %360, %361 : vector<2x128xf32>
    %cst_319 = arith.constant dense<0.000000e+00> : vector<2x128xf32>
    %363 = tpu.matmul %345, %351, %cst_319 {dimension_numbers = #tpu.dot_dimension_numbers<[1], [0], [0], [1], [0, 0, 1, 1], [], []>} : vector<2x96xbf16>, vector<96x128xbf16>, vector<2x128xf32> -> vector<2x128xf32>
    %364 = arith.addf %362, %363 : vector<2x128xf32>
    %365 = vector.broadcast %352 : vector<1x128xf32> to vector<2x128xf32>
    %366 = arith.addf %364, %365 : vector<2x128xf32>
    %cst_320 = arith.constant 0.000000e+00 : f32
    %367 = vector.broadcast %cst_320 : f32 to vector<2x128xf32>
    %368 = arith.maximumf %359, %367 : vector<2x128xf32>
    %cst_321 = arith.constant 0.000000e+00 : f32
    %369 = vector.broadcast %cst_321 : f32 to vector<2x128xf32>
    %370 = arith.maximumf %366, %369 : vector<2x128xf32>
    %371 = vector.extract_strided_slice %368 {offsets = [0, 0], sizes = [2, 64], strides = [1, 1]} : vector<2x128xf32> to vector<2x64xf32>
    %372 = vector.extract_strided_slice %368 {offsets = [0, 64], sizes = [2, 64], strides = [1, 1]} : vector<2x128xf32> to vector<2x64xf32>
    %373 = arith.maximumf %371, %372 : vector<2x64xf32>
    %374 = vector.extract_strided_slice %370 {offsets = [0, 0], sizes = [2, 64], strides = [1, 1]} : vector<2x128xf32> to vector<2x64xf32>
    %375 = vector.extract_strided_slice %370 {offsets = [0, 64], sizes = [2, 64], strides = [1, 1]} : vector<2x128xf32> to vector<2x64xf32>
    %376 = arith.maximumf %374, %375 : vector<2x64xf32>
    %377 = arith.maximumf %373, %376 : vector<2x64xf32>
    %c0_322 = arith.constant 0 : index
    %c0_323 = arith.constant 0 : index
    %378 = vector.load %arg8[%c0_322, %c0_323] : memref<1x32xf32, #tpu.memory_space<vmem>>, vector<1x32xf32>
    %379 = vector.extract_strided_slice %377 {offsets = [0, 0], sizes = [1, 64], strides = [1, 1]} : vector<2x64xf32> to vector<1x64xf32>
    %380 = arith.truncf %379 : vector<1x64xf32> to vector<1x64xbf16>
    %c0_324 = arith.constant 0 : index
    %c0_325 = arith.constant 0 : index
    %c0_326 = arith.constant 0 : index
    %381 = vector.load %arg7[%c0_324, %c0_325, %c0_326] : memref<2x64x32xbf16, #tpu.memory_space<vmem>>, vector<1x64x32xbf16>
    %382 = vector.shape_cast %381 : vector<1x64x32xbf16> to vector<64x32xbf16>
    %cst_327 = arith.constant dense<0.000000e+00> : vector<1x32xf32>
    %383 = tpu.matmul %380, %382, %cst_327 {dimension_numbers = #tpu.dot_dimension_numbers<[1], [0], [0], [1], [0, 0, 1, 1], [], []>} : vector<1x64xbf16>, vector<64x32xbf16>, vector<1x32xf32> -> vector<1x32xf32>
    %384 = arith.addf %378, %383 : vector<1x32xf32>
    %385 = vector.extract_strided_slice %377 {offsets = [1, 0], sizes = [1, 64], strides = [1, 1]} : vector<2x64xf32> to vector<1x64xf32>
    %386 = arith.truncf %385 : vector<1x64xf32> to vector<1x64xbf16>
    %c1_328 = arith.constant 1 : index
    %c0_329 = arith.constant 0 : index
    %c0_330 = arith.constant 0 : index
    %387 = vector.load %arg7[%c1_328, %c0_329, %c0_330] : memref<2x64x32xbf16, #tpu.memory_space<vmem>>, vector<1x64x32xbf16>
    %388 = vector.shape_cast %387 : vector<1x64x32xbf16> to vector<64x32xbf16>
    %cst_331 = arith.constant dense<0.000000e+00> : vector<1x32xf32>
    %389 = tpu.matmul %386, %388, %cst_331 {dimension_numbers = #tpu.dot_dimension_numbers<[1], [0], [0], [1], [0, 0, 1, 1], [], []>} : vector<1x64xbf16>, vector<64x32xbf16>, vector<1x32xf32> -> vector<1x32xf32>
    %390 = arith.addf %384, %389 : vector<1x32xf32>
    %c1_332 = arith.constant 1 : index
    %c0_333 = arith.constant 0 : index
    %391 = vector.load %arg9[%c1_332, %c0_333] : memref<2x32xf32, #tpu.memory_space<vmem>>, vector<1x32xf32>
    tpu.vector_store %arg9[%c1_332, %c0_333], %390 {strides = array<i32>} : memref<2x32xf32, #tpu.memory_space<vmem>>, vector<1x32xf32>,
    return
  }
}

</mosaic_0001>

<bundles_post_ra>
// kernel: frame_encoder_forward.1
= control target key start
LH: loop header
LB: loop body
LE: loop exit
PB: predicated region body
PF: predicated region fallthrough
CT: control target
= control target key end

     0   :  { %vm176_vm0 = vcmask 130048   ;;  %s3982_s0 = inlined_call_operand.vmem [shape: f32[2,2,9,144], index: 0, kind: input, shape index: {}]   ;;  %s3983_s1 = inlined_call_operand.vmem [shape: bf16[3,144,128], index: 1, kind: input, shape index: {}]   ;;  %s3984_s2 = inlined_call_operand.vmem [shape: f32[1,128], index: 2, kind: input, shape index: {}]   ;;  %s3985_s3 = inlined_call_operand.vmem [shape: bf16[3,80,128], index: 3, kind: input, shape index: {}]   ;;  %s3986_s4 = inlined_call_operand.vmem [shape: f32[1,128], index: 4, kind: input, shape index: {}]   ;;  %s3987_s5 = inlined_call_operand.vmem [shape: bf16[3,96,128], index: 5, kind: input, shape index: {}]   ;;  %s3988_s6 = inlined_call_operand.vmem [shape: f32[1,128], index: 6, kind: input, shape index: {}]   ;;  %s3989_s7 = inlined_call_operand.vmem [shape: bf16[2,64,32], index: 7, kind: input, shape index: {}]   ;;  %s3990_s8 = inlined_call_operand.vmem [shape: f32[1,32], index: 8, kind: input, shape index: {}]   ;;  %s3991_s9 = inlined_call_operand.hbm [shape: f32[2,32], index: 9, kind: output, shape index: {}]  }
   0x1   :  { %v3027_v0 = vld [vmem:[%s3983_s1 + $0x80] sm:$0xff]  ;;  %v3251_v1 = vld [vmem:[%s3983_s1 + $0x88] sm:$0xff]  ;;  %v3256_v2 = vld [vmem:[%s3983_s1 + $0x38] sm:$0xff] }
   0x2   :  { %v3261_v3 = vld [vmem:[%s3983_s1 + $0xc8] sm:$0xff]  ;;  %180 = vmatpush.bf16.msra.mxu0 %v3027_v0  ;;  %200 = vmatpush.bf16.msra.mxu1 %v3251_v1  ;;  %v3026_v4 = vld [vmem:[%s3983_s1 + $0x78] sm:$0xff]  ;;  %v3272_v5 = vld [vmem:[%s3983_s1 + $0x30] sm:$0xff] }
   0x3   :  { %263 = vmatpush.bf16.msra.mxu2 %v3256_v2  ;;  %v3277_v6 = vld [vmem:[%s3983_s1 + $0xc0] sm:$0xff]  ;;  %v2234_v8 = vld [vmem:[%s3982_s0 + $0x48] sm:$0xff]  ;;  %v3296_v11 = vld [vmem:[%s3983_s1 + $0xd0] sm:$0xff] }
   0x4   :  { %v3282_v7 = vld [vmem:[%s3983_s1 + $0x40] sm:$0xff]  ;;  %v3288_v9 = vpack.c.bf16 %v2234_v8, %v2234_v8  ;;  %v45_v10 = vld [vmem:[%s3982_s0 + $0x8] sm:$0xff]  ;;  %v3025_v12 = vld [vmem:[%s3983_s1 + $0x70] sm:$0xff] }
   0x5   :  { %283 = vmatpush.bf16.msra.mxu3 %v3282_v7  ;;  %v47_v13 = vpack.c.bf16 %v45_v10, %v45_v10  ;;  %v3306_v14 = vld [vmem:[%s3983_s1 + $0x28] sm:$0xff]  ;;  %v3311_v15 = vld [vmem:[%s3983_s1 + $0xb8] sm:$0xff]  ;;  %v3331_v19 = vld [vmem:[%s3983_s1 + $0x20] sm:$0xff] }
   0x6   :  { %361 = vmatpush.bf16.msrb.mxu1 %v3261_v3  ;;  %181 = vmatpush.bf16.msra.mxu0 %v3026_v4  ;;  %v54_v16 = vld [vmem:[%s3982_s0 + $0x8] sm:$0xfe]  ;;  %v56_v18 = vld [vmem:[%s3982_s0 + $0x18] sm:$0x1]  ;;  %v3336_v20 = vld [vmem:[%s3983_s1 + $0xb0] sm:$0xff] }
   0x7   :  { %264 = vmatpush.bf16.msra.mxu2 %v3272_v5  ;;  %2311 = vmatmul.msk.bf16.vlgmr.msra.gmra.mxu1 %vm176_vm0, %v3288_v9  ;;  %v3024_v17 = vld [vmem:[%s3983_s1 + $0x68] sm:$0xff]  ;;  %v58_v21 = vpack.c.bf16 %v56_v18, %v54_v16  ;;  %v3023_v23 = vld [vmem:[%s3983_s1 + $0x60] sm:$0xff]  ;;  %v3344_v24 = vld [vmem:[%s3983_s1 + $0x18] sm:$0xff] }
   0x8   :  { %2348 = vmatmul.msk.bf16.vlgmr.msra.gmra.mxu3 %vm176_vm0, %v47_v13 }
   0x9   :  { %381 = vmatpush.bf16.msrb.mxu3 %v3296_v11  ;;  %v299_v22 = vshll.u32 %v58_v21, 16 }
   0xa   :  { %362 = vmatpush.bf16.msrb.mxu1 %v3277_v6  ;;  %182 = vmatpush.bf16.msra.mxu0 %v3025_v12 }
   0xb   :  { %265 = vmatpush.bf16.msra.mxu2 %v3306_v14 }
   0xd   :  { %392 = vmatpush.bf16.msra.mxu3 %v3027_v0 }
   0xe   :  { %363 = vmatpush.bf16.msrb.mxu1 %v3311_v15  ;;  %183 = vmatpush.bf16.msra.mxu0 %v3024_v17 }
  0x11   :  { %393 = vmatpush.bf16.msra.mxu3 %v3026_v4 }
  0x12   :  { %14 = vsyncpa [#allocation5], 0  ;;  %266 = vmatpush.bf16.msra.mxu2 %v3331_v19  ;;  %364 = vmatpush.bf16.msrb.mxu1 %v3336_v20  ;;  %v3351_v25 = vld [vmem:[%s3983_s1 + $0xa8] sm:$0xff]  ;;  %v53_v26 = vld [vmem:[%s3982_s0] sm:$0xfe]  ;;  %v297_v28 = vshrl.u32 %v58_v21, 16 }
  0x13   :  { %v55_v27 = vld [vmem:[%s3982_s0 + $0x10] sm:$0x1]  ;;  %v301_v29 = vrot.slane %v299_v22, 1  ;;  %184 = vmatpush.bf16.msra.mxu0 %v3023_v23  ;;  %v3022_v30 = vld [vmem:[%s3983_s1 + $0x58] sm:$0xff]  ;;  %v3031_v33 = vld [vmem:[%s3983_s1 + $0xa0] sm:$0xff]  ;;  %s3192_s26 = smov 64  }
  0x14   :  { %v57_v31 = vpack.c.bf16 %v55_v27, %v53_v26  ;;  %v3013_v32 = vld [vmem:[%s3983_s1 + $0x10] sm:$0xff]  ;;  %v3012_v37 = vld [vmem:[%s3983_s1 + $0x8] sm:$0xff]  ;;  %v3030_v38 = vld [vmem:[%s3983_s1 + $0x98] sm:$0xff]  ;;  %vm34_vm1 = vcmask 651264   ;;  %vm504_vm2 = vcmask 516096   ;;  %vm506_vm3 = vcmask 517121  }
  0x15   :  { %394 = vmatpush.bf16.msra.mxu3 %v3025_v12  ;;  %v302_v34 = vor.u32 %v301_v29, %v297_v28  ;;  %v3021_v35 = vld [vmem:[%s3983_s1 + $0x50] sm:$0xff]  ;;  %v3020_v39 = vld [vmem:[%s3983_s1 + $0x48] sm:$0xff]  ;;  %v2233_v40 = vld [vmem:[%s3982_s0 + $0x40] sm:$0xff]  ;;  %vm508_vm4 = vcmask 518146   ;;  %vm510_vm5 = vcmask 519171   ;;  %vm512_vm6 = vcmask 520196  }
  0x16   :  { %267 = vmatpush.bf16.msra.mxu2 %v3344_v24  ;;  %365 = vmatpush.bf16.msrb.mxu1 %v3351_v25  ;;  %v292_v36 = vshll.u32 %v57_v31, 16  ;;  %v290_v41 = vshrl.u32 %v57_v31, 16  ;;  %v3011_v43 = vld [vmem:[%s3983_s1] sm:$0xff]  ;;  %v3029_v44 = vld [vmem:[%s3983_s1 + $0x90] sm:$0xff]  ;;  %v51_v46 = vpack.c.bf16 %v2233_v40, %v2233_v40  ;;  %v2236_v51 = vld [vmem:[%s3982_s0 + $0x48] sm:$0xfe] }
  0x17   :  { %185 = vmatpush.bf16.msra.mxu0 %v3022_v30  ;;  %v44_v45 = vld [vmem:[%s3982_s0] sm:$0xff]  ;;  %v2237_v50 = vld [vmem:[%s3982_s0 + $0x50] sm:$0x1]  ;;  %v2238_v52 = vld [vmem:[%s3982_s0 + $0x58] sm:$0x1]  ;;  %vm514_vm7 = vcmask 521221  }
  0x18   :  { %2385 = vmatmul.msk.bf16.vlgmr.msrb.gmra.mxu3 %vm176_vm0, %v302_v34  ;;  %v294_v42 = vrot.slane %v292_v36, 1  ;;  %v46_v47 = vpack.c.bf16 %v44_v45, %v44_v45  ;;  %v2235_v49 = vld [vmem:[%s3982_s0 + $0x40] sm:$0xfe]  ;;  %v64_v54 = vpack.c.bf16 %v2238_v52, %v2236_v51  ;;  %v3052_v40 = vld [vmem:[%s3985_s3 + $0x70] sm:$0xff]  ;;  %v3045_v45 = vld [vmem:[%s3985_s3 + $0x38] sm:$0xff]  ;;  %vm516_vm8 = vcmask 522246  }
  0x19   :  { %395 = vmatpush.bf16.msra.mxu3 %v3024_v17  ;;  %v63_v53 = vpack.c.bf16 %v2237_v50, %v2235_v49  ;;  %v3039_v49 = vld [vmem:[%s3985_s3 + $0x8] sm:$0xff]  ;;  %v3049_v50 = vld [vmem:[%s3985_s3 + $0x58] sm:$0xff]  ;;  %v3038_v52 = vld [vmem:[%s3985_s3] sm:$0xff]  ;;  %vm518_vm9 = vcmask 523271   ;;  %vm591_vm10 = vcmask 654336   ;;  %vm39_vm11 = vcmask 780288  }
  0x1a   :  { %268 = vmatpush.bf16.msra.mxu2 %v3013_v32  ;;  %366 = vmatpush.bf16.msrb.mxu1 %v3031_v33  ;;  %v295_v48 = vor.u32 %v294_v42, %v290_v41  ;;  %v454_v56 = vshll.u32 %v64_v54, 16  ;;  %v452_v59 = vshrl.u32 %v64_v54, 16  ;;  %v3046_v41 = vld [vmem:[%s3985_s3 + $0x40] sm:$0xff]  ;;  %v3041_v42 = vld [vmem:[%s3985_s3 + $0x18] sm:$0xff]  ;;  %v3043_v51 = vld [vmem:[%s3985_s3 + $0x28] sm:$0xff]  ;;  %vm850_vm12 = vcmask 785408  }
  0x1b   :  { %186 = vmatpush.bf16.msra.mxu0 %v3021_v35  ;;  %v447_v55 = vshll.u32 %v63_v53, 16  ;;  %v445_v57 = vshrl.u32 %v63_v53, 16  ;;  %v3048_v53 = vld [vmem:[%s3985_s3 + $0x50] sm:$0xff]  ;;  %vm1067_vm13 = vcmask 523264   ;;  %vm1137_vm14 = vcmask 253952   ;;  %s3194_s22 = smov [#allocation4]  }
  0x1c   :  { %v456_v60 = vrot.slane %v454_v56, 1  ;;  %s2224_s24 = sshll.u32 %s3991_s9, 4  ;;  %s2225_s24 = int_to_ptr.hbm [resolvable:$true] %s2224_s24 }
  0x1d   :  { %396 = vmatpush.bf16.msra.mxu3 %v3023_v23  ;;  %v449_v58 = vrot.slane %v447_v55, 1 }
  0x1e   :  { %269 = vmatpush.bf16.msra.mxu2 %v3012_v37  ;;  %367 = vmatpush.bf16.msrb.mxu1 %v3030_v38  ;;  %v457_v62 = vor.u32 %v456_v60, %v452_v59 }
  0x1f   :  { %187 = vmatpush.bf16.msra.mxu0 %v3020_v39  ;;  %v450_v61 = vor.u32 %v449_v58, %v445_v57 }
  0x21   :  { %397 = vmatpush.bf16.msra.mxu3 %v3022_v30 }
  0x22   :  { %270 = vmatpush.bf16.msra.mxu2 %v3011_v43  ;;  %368 = vmatpush.bf16.msrb.mxu1 %v3029_v44 }
  0x23   :  { %412 = vmatpush.bf16.msrb.mxu0 %v3251_v1 }
  0x24   :  { %188 = vmatmul.bf16.vlgmr.msra.gmra.mxu0 %v51_v46 }
  0x25   :  { %271 = vmatmul.bf16.vlgmr.msra.gmra.mxu2 %v46_v47  ;;  %369 = vmatmul.bf16.vlgmr.msrb.gmra.mxu1 %v295_v48  ;;  %v3050_v47 = vld [vmem:[%s3985_s3 + $0x60] sm:$0xff] }
  0x26   :  { %418 = vmatpush.bf16.msrb.mxu2 %v3256_v2  ;;  %438 = vmatpush.bf16.msra.mxu1 %v3282_v7 }
  0x27   :  { %462 = vmatpush.bf16.msra.mxu0 %v3261_v3  ;;  %398 = vmatpush.bf16.msra.mxu3 %v3021_v35 }
  0x2a   :  { %419 = vmatpush.bf16.msrb.mxu2 %v3272_v5  ;;  %482 = vmatpush.bf16.msrb.mxu1 %v3296_v11 }
  0x2b   :  { %463 = vmatpush.bf16.msra.mxu0 %v3277_v6  ;;  %399 = vmatpush.bf16.msra.mxu3 %v3020_v39  ;;  %v3042_v39 = vld [vmem:[%s3985_s3 + $0x20] sm:$0xff] }
  0x2e   :  { %420 = vmatpush.bf16.msrb.mxu2 %v3306_v14  ;;  %400 = vmatmul.bf16.vlgmr.msra.gmra.mxu3 %v295_v48  ;;  %v3160_v14 = vld [vmem:[%s3984_s2] ss:$0 sm:$0xff]  ;;  %v3044_v48 = vld [vmem:[%s3985_s3 + $0x30] sm:$0xff] }
  0x2f   :  { %464 = vmatpush.bf16.msra.mxu0 %v3311_v15 }
  0x32   :  { %421 = vmatpush.bf16.msrb.mxu2 %v3331_v19 }
  0x33   :  { %465 = vmatpush.bf16.msra.mxu0 %v3336_v20 }
  0x34   :  { %2386 = vmatmul.msk.bf16.vlgmr.msrb.gmra.mxu0 %vm176_vm0, %v302_v34 }
  0x35   :  { %2387 = vmatmul.msk.bf16.vlgmr.msra.gmra.mxu1 %vm176_vm0, %v3288_v9 }
  0x36   :  { %422 = vmatpush.bf16.msrb.mxu2 %v3344_v24  ;;  %690 = vmatpush.bf16.msra.mxu1 %v3052_v40 }
  0x37   :  { %466 = vmatpush.bf16.msra.mxu0 %v3351_v25 }
  0x3a   :  { %423 = vmatpush.bf16.msrb.mxu2 %v3013_v32 }
  0x3b   :  { %467 = vmatpush.bf16.msra.mxu0 %v3031_v33 }
  0x3e   :  { %424 = vmatpush.bf16.msrb.mxu2 %v3012_v37 }
  0x3f   :  { %468 = vmatpush.bf16.msra.mxu0 %v3030_v38  ;;  %v3047_v38 = vld [vmem:[%s3985_s3 + $0x48] sm:$0xff] }
  0x40   :  { %598 = vmatpush.bf16.msrb.mxu3 %v3047_v38 }
  0x42   :  { %425 = vmatpush.bf16.msrb.mxu2 %v3011_v43  ;;  %v3051_v43 = vld [vmem:[%s3985_s3 + $0x68] sm:$0xff] }
  0x43   :  { %469 = vmatpush.bf16.msra.mxu0 %v3029_v44  ;;  %691 = vmatpush.bf16.msra.mxu1 %v3051_v43  ;;  %v3193_v44 = vmov 0.0  }
  0x44   :  { %599 = vmatpush.bf16.msrb.mxu3 %v3046_v41  ;;  %35 = vst.msk [vmem:[#allocation2] sm:$0x1f] %vm34_vm1, %v3193_v44 }
  0x45   :  { %426 = vmatmul.bf16.vlgmr.msrb.gmra.mxu2 %v51_v46  ;;  %2388 = vmatmul.msk.bf16.vlgmr.msrb.gmra.mxu1 %vm176_vm0, %v457_v62  ;;  %37 = vst.msk [vmem:[#allocation2 + $0x10] sm:$0x1f] %vm34_vm1, %v3193_v44  ;;  %v3040_v46 = vld [vmem:[%s3985_s3 + $0x10] sm:$0xff] }
  0x46   :  { %470 = vmatmul.bf16.vlgmr.msra.gmra.mxu0 %v450_v61  ;;  %644 = vmatpush.bf16.msra.mxu2 %v3042_v39  ;;  %36 = vst.msk [vmem:[#allocation2 + $0x8] sm:$0x1f] %vm34_vm1, %v3193_v44 }
  0x47   :  { %721 = vmatpush.bf16.msrb.mxu0 %v3042_v39  ;;  %38 = vst.msk [vmem:[#allocation2 + $0x18] sm:$0x1f] %vm34_vm1, %v3193_v44  ;;  %692 = vmatpush.bf16.msra.mxu1 %v3050_v47  ;;  %v3053_v39 = vld [vmem:[%s3987_s5] sm:$0xff] }
  0x48   :  { %600 = vmatpush.bf16.msrb.mxu3 %v3045_v45  ;;  %40 = vst.msk [vmem:[#allocation3] sm:$0x7] %vm39_vm11, %v3193_v44 }
  0x49   :  { %42 = vst.msk [vmem:[#allocation3 + $0x8] sm:$0x7] %vm39_vm11, %v3193_v44 }
  0x4a   :  { %645 = vmatpush.bf16.msra.mxu2 %v3041_v42  ;;  %41 = vst.msk [vmem:[#allocation3 + $0x4] sm:$0x7] %vm39_vm11, %v3193_v44 }
  0x4b   :  { %722 = vmatpush.bf16.msrb.mxu0 %v3041_v42  ;;  %693 = vmatpush.bf16.msra.mxu1 %v3049_v50  ;;  %43 = vst.msk [vmem:[#allocation3 + $0xc] sm:$0x7] %vm39_vm11, %v3193_v44 }
  0x4c   :  { %601 = vmatpush.bf16.msrb.mxu3 %v3044_v48 }
  0x4e   :  { %646 = vmatpush.bf16.msra.mxu2 %v3040_v46 }
  0x4f   :  { %723 = vmatpush.bf16.msrb.mxu0 %v3040_v46  ;;  %694 = vmatpush.bf16.msra.mxu1 %v3048_v53 }
  0x50   :  { %602 = vmatpush.bf16.msrb.mxu3 %v3043_v51 }
  0x52   :  { %647 = vmatpush.bf16.msra.mxu2 %v3039_v49 }
  0x53   :  { %724 = vmatpush.bf16.msrb.mxu0 %v3039_v49 }
  0x54   :  { %708 = vmatpush.bf16.msra.mxu3 %v3047_v38  ;;  %v3059_v38 = vld [vmem:[%s3987_s5 + $0x30] sm:$0xff] }
  0x56   :  { %648 = vmatpush.bf16.msra.mxu2 %v3038_v52 }
  0x57   :  { %725 = vmatpush.bf16.msrb.mxu0 %v3038_v52 }
  0x58   :  { %709 = vmatpush.bf16.msra.mxu3 %v3046_v41  ;;  %v3065_v41 = vld [vmem:[%s3987_s5 + $0x60] sm:$0xff] }
  0x5a   :  { %737 = vmatpush.bf16.msrb.mxu2 %v3052_v40  ;;  %v3066_v40 = vld [vmem:[%s3987_s5 + $0x68] sm:$0xff] }
  0x5c   :  { %710 = vmatpush.bf16.msra.mxu3 %v3045_v45 }
  0x5e   :  { %738 = vmatpush.bf16.msrb.mxu2 %v3051_v43 }
  0x60   :  { %711 = vmatpush.bf16.msra.mxu3 %v3044_v48 }
  0x62   :  { %739 = vmatpush.bf16.msrb.mxu2 %v3050_v47 }
  0x64   :  { %712 = vmatpush.bf16.msra.mxu3 %v3043_v51 }
  0x66   :  { %740 = vmatpush.bf16.msrb.mxu2 %v3049_v50 }
  0x6a   :  { %741 = vmatpush.bf16.msrb.mxu2 %v3048_v53 }
  0x84   :  { %v202_v63 = vpop.f32.mrf.mxu1 }
  0x8b   :  { %v285_v0 = vpop.f32.mrf.mxu3 }
  0x8c   :  { %v204_v1 = vpop.f32.mrf.mxu1 }
  0x93   :  { %v287_v2 = vpop.f32.mrf.mxu3 }
  0x9b   :  { %v383_v3 = vpop.f32.mrf.mxu3 }
  0xa1   :  { %v189_v4 = vpop.f32.mrf.mxu0 }
  0xa2   :  { %v370_v5 = vpop.f32.mrf.mxu1  ;;  %v203_v7 = vadd.f32 %v202_v63, %v189_v4 }
  0xa3   :  { %v385_v6 = vpop.f32.mrf.mxu3  ;;  %v384_v12 = vadd.f32 %v383_v3, %v370_v5 }
  0xa8   :  { %v272_v8 = vpop.f32.mrf.mxu2 }
  0xa9   :  { %v273_v9 = vadd.f32 %v272_v8, %v203_v7  ;;  %v191_v10 = vpop.f32.mrf.mxu0  ;;  %v3161_v8 = vld [vmem:[%s3986_s4] ss:$0 sm:$0xff] }
  0xaa   :  { %v372_v11 = vpop.f32.mrf.mxu1 }
  0xab   :  { %v286_v13 = vadd.f32 %v285_v0, %v273_v9 }
  0xad   :  { %v387_v15 = vadd.f32 %v384_v12, %v286_v13 }
  0xaf   :  { %v3427_v16 = vadd.f32 %v3160_v14, %v387_v15 }
  0xb0   :  { %v274_v17 = vpop.f32.mrf.mxu2 }
  0xb1   :  { %v401_v18 = vpop.f32.mrf.mxu3  ;;  %v414_v19 = vpop.f32.mrf.mxu0  ;;  %v490_v20 = vmax.f32 %v3427_v16, 0.0 }
  0xb2   :  { %v440_v21 = vpop.f32.mrf.mxu1  ;;  %v415_v27 = vadd.f32 %v414_v19, %v401_v18 }
  0xb3   :  { %493 = vrot.lane.b32.xlu0 %v490_v20, %s3192_s26 }
  0xb9   :  { %v403_v22 = vpop.f32.mrf.mxu3  ;;  %v416_v23 = vpop.f32.mrf.mxu0 }
  0xba   :  { %v442_v24 = vpop.f32.mrf.mxu1 }
  0xbb   :  { %v3064_v24 = vld [vmem:[%s3987_s5 + $0x58] sm:$0xff] }
  0xbc   :  { %856 = vmatpush.bf16.msrb.mxu1 %v3064_v24 }
  0xc2   :  { %v484_v26 = vpop.f32.mrf.mxu1 }
  0xc3   :  { %v471_v25 = vpop.f32.mrf.mxu0 }
  0xc4   :  { %v485_v29 = vadd.f32 %v484_v26, %v471_v25  ;;  %v3058_v25 = vld [vmem:[%s3987_s5 + $0x28] sm:$0xff] }
  0xc5   :  { %v3070_v26 = vld [vmem:[%s3987_s5 + $0x88] sm:$0xff] }
  0xc6   :  { %960 = vmatpush.bf16.msra.mxu0 %v3070_v26 }
  0xc8   :  { %v427_v28 = vpop.f32.mrf.mxu2 }
  0xc9   :  { %v428_v30 = vadd.f32 %v427_v28, %v415_v27  ;;  %v3063_v27 = vld [vmem:[%s3987_s5 + $0x50] sm:$0xff]  ;;  %v3057_v28 = vld [vmem:[%s3987_s5 + $0x20] sm:$0xff] }
  0xca   :  { %v486_v34 = vpop.f32.mrf.mxu1  ;;  %857 = vmatpush.bf16.msrb.mxu1 %v3063_v27 }
  0xcb   :  { %v441_v31 = vadd.f32 %v440_v21, %v428_v30  ;;  %v473_v33 = vpop.f32.mrf.mxu0  ;;  %v3062_v30 = vld [vmem:[%s3987_s5 + $0x48] sm:$0xff]  ;;  %v3055_v34 = vld [vmem:[%s3987_s5 + $0x10] sm:$0xff] }
  0xcc   :  { %v3061_v33 = vld [vmem:[%s3987_s5 + $0x40] sm:$0xff] }
  0xcd   :  { %v488_v32 = vadd.f32 %v485_v29, %v441_v31  ;;  %v3069_v29 = vld [vmem:[%s3987_s5 + $0x80] sm:$0xff]  ;;  %v3056_v31 = vld [vmem:[%s3987_s5 + $0x18] sm:$0xff] }
  0xce   :  { %961 = vmatpush.bf16.msra.mxu0 %v3069_v29  ;;  %858 = vmatpush.bf16.msrb.mxu1 %v3062_v30 }
  0xcf   :  { %v489_v35 = vadd.f32 %v3160_v14, %v488_v32  ;;  %v3068_v32 = vld [vmem:[%s3987_s5 + $0x78] sm:$0xff] }
  0xd0   :  { %v429_v36 = vpop.f32.mrf.mxu2 }
  0xd1   :  { %v491_v37 = vmax.f32 %v489_v35, 0.0  ;;  %v3060_v35 = vld [vmem:[%s3987_s5 + $0x38] sm:$0xff]  ;;  %v3054_v36 = vld [vmem:[%s3987_s5 + $0x8] sm:$0xff] }
  0xd2   :  { %962 = vmatpush.bf16.msra.mxu0 %v3068_v32  ;;  %859 = vmatpush.bf16.msrb.mxu1 %v3061_v33 }
  0xd3   :  { %498 = vrot.lane.b32.xlu0 %v491_v37, %s3192_s26 }
  0xd6   :  { %860 = vmatpush.bf16.msrb.mxu1 %v3060_v35 }
  0xda   :  { %861 = vmatpush.bf16.msrb.mxu1 %v3059_v38 }
 0x125   :  { %v494_v54 = vpop.permute.xlu0 %493 }
 0x126   :  { %v496_v56 = vmax.f32 %v490_v20, %v494_v54 }
 0x145   :  { %v499_v55 = vpop.permute.xlu0 %498 }
 0x146   :  { %v501_v57 = vmax.f32 %v491_v37, %v499_v55  ;;  %v3067_v37 = vld [vmem:[%s3987_s5 + $0x70] sm:$0xff]  ;;  %v3589_v55 = vld [vmem:[%s3983_s1 + $0x80] sm:$0xff] }
 0x147   :  { %963 = vmatpush.bf16.msra.mxu0 %v3067_v37 }
 0x148   :  { %v502_v58 = vmax.f32 %v496_v56, %v501_v57  ;;  %v3594_v56 = vld [vmem:[%s3983_s1 + $0x38] sm:$0xff] }
 0x149   :  { %v3074_v57 = vld [vmem:[%s3989_s7 + $0x18] sm:$0xff] }
 0x14a   :  { %505 = vst.msk [vmem:[#allocation2 + $0x10] sm:$0x1] %vm504_vm2, %v502_v58 }
 0x14b   :  { %507 = vst.msk [vmem:[#allocation2] sm:$0x2] %vm506_vm3, %v502_v58  ;;  %964 = vmatpush.bf16.msra.mxu0 %v3066_v40 }
 0x14c   :  { %509 = vst.msk [vmem:[#allocation2 + $0xf] sm:$0x4] %vm508_vm4, %v502_v58 }
 0x14d   :  { %511 = vst.msk [vmem:[#allocation2 - $0x1] sm:$0x8] %vm510_vm5, %v502_v58 }
 0x14e   :  { %513 = vst.msk [vmem:[#allocation2 + $0xe] sm:$0x10] %vm512_vm6, %v502_v58 }
 0x14f   :  { %515 = vst.msk [vmem:[#allocation2 - $0x2] sm:$0x20] %vm514_vm7, %v502_v58  ;;  %965 = vmatpush.bf16.msra.mxu0 %v3065_v41 }
 0x150   :  { %517 = vst.msk [vmem:[#allocation2 + $0xd] sm:$0x40] %vm516_vm8, %v502_v58 }
 0x151   :  { %519 = vst.msk [vmem:[#allocation2 - $0x3] sm:$0x80] %vm518_vm9, %v502_v58 }
 0x156   :  { %v520_v59 = vld [vmem:[#allocation2] sm:$0xf] }
 0x157   :  { %v522_v60 = vld [vmem:[#allocation2 + $0x10] sm:$0xf]  ;;  %v521_v61 = vpack.c.bf16 %v520_v59, %v520_v59  ;;  %v3603_v59 = vld [vmem:[%s3983_s1 + $0x78] sm:$0xff] }
 0x158   :  { %v523_v62 = vpack.c.bf16 %v522_v60, %v522_v60  ;;  %v524_v63 = vld [vmem:[#allocation2 + $0x1] sm:$0xf]  ;;  %v526_v1 = vld [vmem:[#allocation2 + $0x11] sm:$0xf] }
 0x159   :  { %2450 = vmatmul.msk.bf16.vlgmr.msra.gmra.mxu2 %vm591_vm10, %v521_v61  ;;  %v525_v0 = vpack.c.bf16 %v524_v63, %v524_v63  ;;  %v527_v2 = vpack.c.bf16 %v526_v1, %v526_v1  ;;  %v3609_v60 = vld [vmem:[%s3983_s1 + $0x30] sm:$0xff]  ;;  %v3078_v61 = vld [vmem:[%s3989_s7 + $0x38] sm:$0xff] }
 0x15a   :  { %2429 = vmatmul.msk.bf16.vlgmr.msrb.gmra.mxu3 %vm591_vm10, %v523_v62  ;;  %2473 = vmatmul.msk.bf16.vlgmr.msrb.gmra.mxu0 %vm591_vm10, %v523_v62  ;;  %v3073_v63 = vld [vmem:[%s3989_s7 + $0x10] sm:$0xff] }
 0x15b   :  { %2471 = vmatmul.msk.bf16.vlgmr.msra.gmra.mxu1 %vm591_vm10, %v525_v0  ;;  %908 = vmatpush.bf16.msrb.mxu3 %v3058_v25  ;;  %v3624_v1 = vld [vmem:[%s3983_s1 + $0x70] sm:$0xff] }
 0x15c   :  { %978 = vmatpush.bf16.msra.mxu2 %v3064_v24  ;;  %991 = vmatpush.bf16.msra.mxu1 %v3058_v25  ;;  %v3072_v25 = vld [vmem:[%s3989_s7 + $0x8] sm:$0xff] }
 0x15d   :  { %1075 = vmatpush.bf16.msrb.mxu0 %v3074_v57 }
 0x15f   :  { %909 = vmatpush.bf16.msrb.mxu3 %v3057_v28 }
 0x160   :  { %979 = vmatpush.bf16.msra.mxu2 %v3063_v27  ;;  %992 = vmatpush.bf16.msra.mxu1 %v3057_v28  ;;  %v3090_v27 = vld [vmem:[%s3983_s1 + $0x58] sm:$0xff]  ;;  %v3076_v28 = vld [vmem:[%s3989_s7 + $0x28] sm:$0xff] }
 0x161   :  { %1076 = vmatpush.bf16.msrb.mxu0 %v3073_v63 }
 0x163   :  { %910 = vmatpush.bf16.msrb.mxu3 %v3056_v31 }
 0x164   :  { %980 = vmatpush.bf16.msra.mxu2 %v3062_v30  ;;  %993 = vmatpush.bf16.msra.mxu1 %v3056_v31  ;;  %v3674_v30 = vld [vmem:[%s3983_s1 + $0x18] sm:$0xff]  ;;  %v3089_v31 = vld [vmem:[%s3983_s1 + $0x50] sm:$0xff] }
 0x165   :  { %1077 = vmatpush.bf16.msrb.mxu0 %v3072_v25 }
 0x167   :  { %911 = vmatpush.bf16.msrb.mxu3 %v3055_v34 }
 0x168   :  { %981 = vmatpush.bf16.msra.mxu2 %v3061_v33  ;;  %994 = vmatpush.bf16.msra.mxu1 %v3055_v34  ;;  %v3686_v33 = vld [vmem:[%s3983_s1 + $0x10] sm:$0xff]  ;;  %v3088_v34 = vld [vmem:[%s3983_s1 + $0x48] sm:$0xff] }
 0x169   :  { %2474 = vmatmul.msk.bf16.vlgmr.msrb.gmra.mxu2 %vm591_vm10, %v527_v2  ;;  %v3630_v2 = vld [vmem:[%s3983_s1 + $0x28] sm:$0xff] }
 0x16a   :  { %2472 = vmatmul.msk.bf16.vlgmr.msra.gmra.mxu3 %vm591_vm10, %v525_v0  ;;  %v3077_v0 = vld [vmem:[%s3989_s7 + $0x30] sm:$0xff] }
 0x16b   :  { %912 = vmatpush.bf16.msrb.mxu3 %v3054_v36 }
 0x16c   :  { %982 = vmatpush.bf16.msra.mxu2 %v3060_v35  ;;  %995 = vmatpush.bf16.msra.mxu1 %v3054_v36  ;;  %v3096_v35 = vld [vmem:[%s3983_s1 + $0x88] sm:$0xff]  ;;  %v3697_v36 = vld [vmem:[%s3983_s1 + $0x40] sm:$0xff] }
 0x16f   :  { %913 = vmatpush.bf16.msrb.mxu3 %v3053_v39 }
 0x170   :  { %983 = vmatpush.bf16.msra.mxu2 %v3059_v38  ;;  %996 = vmatpush.bf16.msra.mxu1 %v3053_v39  ;;  %v3711_v38 = vld [vmem:[%s3983_s1] sm:$0xff] }
 0x171   :  { %v2619_v39 = vld [vmem:[%s3982_s0 + $0x20] sm:$0xff] }
 0x173   :  { %1007 = vmatpush.bf16.msra.mxu3 %v3070_v26  ;;  %v3659_v26 = vld [vmem:[%s3983_s1 + $0x20] sm:$0xff] }
 0x174   :  { %1127 = vmatpush.bf16.msrb.mxu2 %v3078_v61  ;;  %v2625_v61 = vld [vmem:[%s3982_s0 + $0x30] sm:$0x1] }
 0x177   :  { %1008 = vmatpush.bf16.msra.mxu3 %v3069_v29  ;;  %v3071_v29 = vld [vmem:[%s3989_s7] sm:$0xff] }
 0x178   :  { %1128 = vmatpush.bf16.msrb.mxu2 %v3077_v0  ;;  %1078 = vmatpush.bf16.msrb.mxu0 %v3071_v29 }
 0x17b   :  { %1009 = vmatpush.bf16.msra.mxu3 %v3068_v32  ;;  %v3075_v32 = vld [vmem:[%s3989_s7 + $0x20] sm:$0xff] }
 0x17c   :  { %1129 = vmatpush.bf16.msrb.mxu2 %v3076_v28 }
 0x17f   :  { %1010 = vmatpush.bf16.msra.mxu3 %v3067_v37  ;;  %v3703_v37 = vld [vmem:[%s3983_s1 + $0x8] sm:$0xff] }
 0x180   :  { %1130 = vmatpush.bf16.msrb.mxu2 %v3075_v32 }
 0x183   :  { %1011 = vmatpush.bf16.msra.mxu3 %v3066_v40  ;;  %v1142_v40 = vpack.c.bf16 %v2619_v39, %v2619_v39 }
 0x187   :  { %1012 = vmatpush.bf16.msra.mxu3 %v3065_v41  ;;  %v3104_v41 = vld [vmem:[%s3983_s1 + $0xc8] sm:$0xff] }
 0x1d7   :  { %v727_v3 = vpop.f32.mrf.mxu0 }
 0x1d8   :  { %v696_v4 = vpop.f32.mrf.mxu1 }
 0x1dc   :  { %v650_v5 = vpop.f32.mrf.mxu2 }
 0x1dd   :  { %v604_v6 = vpop.f32.mrf.mxu3 }
 0x1de   :  { %v651_v7 = vadd.f32 %v650_v5, %v604_v6  ;;  %v3636_v6 = vld [vmem:[%s3983_s1 + $0x68] sm:$0xff] }
 0x1df   :  { %v729_v9 = vpop.f32.mrf.mxu0 }
 0x1e0   :  { %v700_v10 = vadd.f32 %v696_v4, %v651_v7  ;;  %v698_v11 = vpop.f32.mrf.mxu1 }
 0x1e2   :  { %v3502_v12 = vadd.f32 %v3161_v8, %v700_v10 }
 0x1e4   :  { %v652_v13 = vpop.f32.mrf.mxu2  ;;  %v749_v14 = vmax.f32 %v3502_v12, 0.0 }
 0x1e5   :  { %v606_v15 = vpop.f32.mrf.mxu3 }
 0x1e6   :  { %752 = vrot.lane.b32.xlu1 %v749_v14, %s3192_s26 }
 0x1ec   :  { %v743_v16 = vpop.f32.mrf.mxu2 }
 0x1ed   :  { %v714_v17 = vpop.f32.mrf.mxu3 }
 0x1ee   :  { %v728_v18 = vadd.f32 %v727_v3, %v714_v17 }
 0x1f0   :  { %v747_v19 = vadd.f32 %v743_v16, %v728_v18 }
 0x1f2   :  { %v3508_v20 = vadd.f32 %v3161_v8, %v747_v19  ;;  %v3091_v8 = vld [vmem:[%s3983_s1 + $0x60] sm:$0xff] }
 0x1f4   :  { %v750_v21 = vmax.f32 %v3508_v20, 0.0  ;;  %v745_v22 = vpop.f32.mrf.mxu2 }
 0x1f5   :  { %v716_v23 = vpop.f32.mrf.mxu3 }
 0x1f6   :  { %757 = vrot.lane.b32.xlu1 %v750_v21, %s3192_s26 }
 0x258   :  { %v753_v42 = vpop.permute.xlu1 %752 }
 0x259   :  { %v755_v44 = vmax.f32 %v749_v14, %v753_v42  ;;  %v3162_v14 = vld [vmem:[%s3988_s6] ss:$0 sm:$0xff] }
 0x25a   :  { %v2621_v42 = vld [vmem:[%s3982_s0 + $0x60] sm:$0xff] }
 0x268   :  { %v758_v43 = vpop.permute.xlu1 %757 }
 0x269   :  { %v760_v45 = vmax.f32 %v750_v21, %v758_v43  ;;  %v3725_v43 = vpack.c.bf16 %v2621_v42, %v2621_v42 }
 0x26b   :  { %v761_v46 = vmax.f32 %v755_v44, %v760_v45  ;;  %v3103_v44 = vld [vmem:[%s3983_s1 + $0xc0] sm:$0xff]  ;;  %v3102_v45 = vld [vmem:[%s3983_s1 + $0xb8] sm:$0xff] }
 0x26d   :  { %763 = vst.msk [vmem:[#allocation3 + $0x8] sm:$0x1] %vm504_vm2, %v761_v46 }
 0x26e   :  { %764 = vst.msk [vmem:[#allocation3] sm:$0x2] %vm506_vm3, %v761_v46 }
 0x26f   :  { %765 = vst.msk [vmem:[#allocation3 + $0x7] sm:$0x4] %vm508_vm4, %v761_v46 }
 0x270   :  { %766 = vst.msk [vmem:[#allocation3 - $0x1] sm:$0x8] %vm510_vm5, %v761_v46  ;;  %v2624_v46 = vld [vmem:[%s3982_s0 + $0x28] sm:$0xfe] }
 0x275   :  { %v767_v47 = vld [vmem:[#allocation3] sm:$0x3] }
 0x276   :  { %v769_v48 = vld [vmem:[#allocation3 + $0x8] sm:$0x3]  ;;  %v768_v49 = vpack.c.bf16 %v767_v47, %v767_v47  ;;  %v2626_v47 = vld [vmem:[%s3982_s0 + $0x38] sm:$0x1] }
 0x277   :  { %v770_v50 = vpack.c.bf16 %v769_v48, %v769_v48  ;;  %v771_v51 = vld [vmem:[#allocation3 + $0x1] sm:$0x3]  ;;  %v773_v53 = vld [vmem:[#allocation3 + $0x9] sm:$0x3]  ;;  %v1154_v48 = vpack.c.bf16 %v2626_v47, %v2624_v46 }
 0x278   :  { %2548 = vmatmul.msk.bf16.vlgmr.msrb.gmra.mxu3 %vm850_vm12, %v768_v49  ;;  %v772_v52 = vpack.c.bf16 %v771_v51, %v771_v51  ;;  %v774_v54 = vpack.c.bf16 %v773_v53, %v773_v53  ;;  %v3101_v53 = vld [vmem:[%s3983_s1 + $0xb0] sm:$0xff] }
 0x279   :  { %2523 = vmatmul.msk.bf16.vlgmr.msrb.gmra.mxu1 %vm850_vm12, %v770_v50  ;;  %1356 = vmatpush.bf16.msrb.mxu3 %v3594_v56  ;;  %v1390_v57 = vshrl.u32 %v1154_v48, 16 }
 0x27a   :  { %2573 = vmatmul.msk.bf16.vlgmr.msra.gmra.mxu0 %vm850_vm12, %v772_v52  ;;  %2574 = vmatmul.msk.bf16.vlgmr.msra.gmra.mxu2 %vm850_vm12, %v772_v52  ;;  %v1392_v52 = vshll.u32 %v1154_v48, 16 }
 0x27b   :  { %1273 = vmatpush.bf16.msrb.mxu1 %v3589_v55  ;;  %1293 = vmatpush.bf16.msra.mxu0 %v3096_v35 }
 0x27c   :  { %1376 = vmatpush.bf16.msra.mxu2 %v3697_v36 }
 0x27d   :  { %1357 = vmatpush.bf16.msrb.mxu3 %v3609_v60 }
 0x27f   :  { %1274 = vmatpush.bf16.msrb.mxu1 %v3603_v59 }
 0x281   :  { %1358 = vmatpush.bf16.msrb.mxu3 %v3630_v2 }
 0x283   :  { %1275 = vmatpush.bf16.msrb.mxu1 %v3624_v1 }
 0x285   :  { %1359 = vmatpush.bf16.msrb.mxu3 %v3659_v26 }
 0x287   :  { %1276 = vmatpush.bf16.msrb.mxu1 %v3636_v6 }
 0x288   :  { %2576 = vmatmul.msk.bf16.vlgmr.msra.gmra.mxu3 %vm850_vm12, %v774_v54 }
 0x289   :  { %2575 = vmatmul.msk.bf16.vlgmr.msra.gmra.mxu1 %vm850_vm12, %v770_v50  ;;  %1360 = vmatpush.bf16.msrb.mxu3 %v3674_v30 }
 0x28b   :  { %1277 = vmatpush.bf16.msrb.mxu1 %v3091_v8 }
 0x28d   :  { %1361 = vmatpush.bf16.msrb.mxu3 %v3686_v33 }
 0x28f   :  { %1278 = vmatpush.bf16.msrb.mxu1 %v3090_v27 }
 0x291   :  { %1362 = vmatpush.bf16.msrb.mxu3 %v3703_v37 }
 0x293   :  { %1279 = vmatpush.bf16.msrb.mxu1 %v3089_v31 }
 0x295   :  { %1363 = vmatpush.bf16.msrb.mxu3 %v3711_v38 }
 0x297   :  { %1280 = vmatpush.bf16.msrb.mxu1 %v3088_v34 }
 0x298   :  { %1364 = vmatmul.bf16.vlgmr.msrb.gmra.mxu3 %v1142_v40 }
 0x299   :  { %1505 = vmatpush.bf16.msra.mxu3 %v3096_v35  ;;  %v1033_v35 = vld [vmem:[%s3990_s8] sm:$0x1] }
 0x29a   :  { %1281 = vmatmul.bf16.vlgmr.msrb.gmra.mxu1 %v3725_v43 }
 0x29b   :  { %1485 = vmatpush.bf16.msra.mxu1 %v3589_v55 }
 0x29d   :  { %1555 = vmatpush.bf16.msrb.mxu3 %v3104_v41 }
 0x29f   :  { %1486 = vmatpush.bf16.msra.mxu1 %v3603_v59  ;;  %v2623_v59 = vld [vmem:[%s3982_s0 + $0x20] sm:$0xfe] }
 0x2a0   :  { %v1153_v0 = vpack.c.bf16 %v2625_v61, %v2623_v59  ;;  %v3163_v59 = vld [vmem:[%s3984_s2] ss:$0 sm:$0xff] }
 0x2a1   :  { %1556 = vmatpush.bf16.msrb.mxu3 %v3103_v44 }
 0x2a3   :  { %1487 = vmatpush.bf16.msra.mxu1 %v3624_v1  ;;  %v3100_v1 = vld [vmem:[%s3983_s1 + $0xa8] sm:$0xff] }
 0x2a5   :  { %1557 = vmatpush.bf16.msrb.mxu3 %v3102_v45 }
 0x2a7   :  { %1488 = vmatpush.bf16.msra.mxu1 %v3636_v6  ;;  %v1383_v6 = vshrl.u32 %v1153_v0, 16 }
 0x2a9   :  { %1558 = vmatpush.bf16.msrb.mxu3 %v3101_v53 }
 0x2ab   :  { %1489 = vmatpush.bf16.msra.mxu1 %v3091_v8 }
 0x2ad   :  { %1559 = vmatpush.bf16.msrb.mxu3 %v3100_v1 }
 0x2af   :  { %1490 = vmatpush.bf16.msra.mxu1 %v3090_v27 }
 0x2b3   :  { %1491 = vmatpush.bf16.msra.mxu1 %v3089_v31 }
 0x2b7   :  { %1492 = vmatpush.bf16.msra.mxu1 %v3088_v34 }
 0x2f6   :  { %v863_v58 = vpop.f32.mrf.mxu1 }
 0x2f7   :  { %v967_v62 = vpop.f32.mrf.mxu0 }
 0x2fb   :  { %v915_v3 = vpop.f32.mrf.mxu3 }
 0x2fc   :  { %v916_v10 = vadd.f32 %v915_v3, %v863_v58  ;;  %v1394_v58 = vrot.slane %v1392_v52, 1 }
 0x2fd   :  { %v985_v4 = vpop.f32.mrf.mxu2 }
 0x2fe   :  { %v865_v5 = vpop.f32.mrf.mxu1  ;;  %v971_v13 = vadd.f32 %v967_v62, %v916_v10  ;;  %v1395_v63 = vor.u32 %v1394_v58, %v1390_v57 }
 0x2ff   :  { %v969_v7 = vpop.f32.mrf.mxu0  ;;  %v3105_v5 = vld [vmem:[%s3983_s1 + $0xd0] sm:$0xff] }
 0x300   :  { %v3646_v18 = vadd.f32 %v3162_v14, %v971_v13  ;;  %2778 = vmatmul.msk.bf16.vlgmr.msra.gmra.mxu3 %vm176_vm0, %v1395_v63  ;;  %1575 = vmatpush.bf16.msrb.mxu1 %v3105_v5  ;;  %v2629_v13 = vld [vmem:[%s3982_s0 + $0x70] sm:$0x1] }
 0x302   :  { %v1020_v22 = vmax.f32 %v3646_v18, 0.0 }
 0x303   :  { %v917_v9 = vpop.f32.mrf.mxu3 }
 0x304   :  { %v3099_v9 = vld [vmem:[%s3983_s1 + $0xa0] sm:$0xff] }
 0x305   :  { %v987_v11 = vpop.f32.mrf.mxu2  ;;  %1560 = vmatpush.bf16.msrb.mxu3 %v3099_v9 }
 0x306   :  { %v998_v12 = vpop.f32.mrf.mxu1  ;;  %v3098_v11 = vld [vmem:[%s3983_s1 + $0x98] sm:$0xff] }
 0x307   :  { %v999_v15 = vadd.f32 %v998_v12, %v985_v4  ;;  %v1385_v4 = vshll.u32 %v1153_v0, 16  ;;  %v2627_v12 = vld [vmem:[%s3982_s0 + $0x60] sm:$0xfe] }
 0x309   :  { %v1387_v8 = vrot.slane %v1385_v4, 1  ;;  %1561 = vmatpush.bf16.msrb.mxu3 %v3098_v11 }
 0x30b   :  { %v1014_v16 = vpop.f32.mrf.mxu3  ;;  %v1388_v10 = vor.u32 %v1387_v8, %v1383_v6 }
 0x30c   :  { %v1018_v17 = vadd.f32 %v1014_v16, %v999_v15  ;;  %v2622_v16 = vld [vmem:[%s3982_s0 + $0x68] sm:$0xff] }
 0x30d   :  { %1493 = vmatmul.bf16.vlgmr.msra.gmra.mxu1 %v1388_v10 }
 0x30e   :  { %v3648_v19 = vadd.f32 %v3162_v14, %v1018_v17  ;;  %v1000_v20 = vpop.f32.mrf.mxu1  ;;  %v1159_v14 = vpack.c.bf16 %v2629_v13, %v2627_v12  ;;  %v3097_v17 = vld [vmem:[%s3983_s1 + $0x90] sm:$0xff]  ;;  %v3115_v13 = vld [vmem:[%s3985_s3 + $0x48] sm:$0xff] }
 0x30f   :  { %v2620_v20 = vld [vmem:[%s3982_s0 + $0x28] sm:$0xff]  ;;  %1562 = vmatpush.bf16.msrb.mxu3 %v3097_v17 }
 0x310   :  { %v1021_v21 = vmax.f32 %v3648_v19, 0.0  ;;  %v1540_v15 = vshll.u32 %v1159_v14, 16  ;;  %v1538_v18 = vshrl.u32 %v1159_v14, 16  ;;  %v1143_v27 = vpack.c.bf16 %v2620_v20, %v2620_v20  ;;  %v3110_v14 = vld [vmem:[%s3985_s3 + $0x20] sm:$0xff]  ;;  %v3108_v20 = vld [vmem:[%s3985_s3 + $0x10] sm:$0xff] }
 0x312   :  { %v3150_v23 = vpack.i.bf16 %v1021_v21, %v1020_v22  ;;  %v1542_v19 = vrot.slane %v1540_v15, 1  ;;  %v3120_v15 = vld [vmem:[%s3985_s3 + $0x70] sm:$0xff] }
 0x313   :  { %v1016_v24 = vpop.f32.mrf.mxu3  ;;  %1773 = vmatpush.bf16.msra.mxu1 %v3120_v15  ;;  %1791 = vmatpush.bf16.msra.mxu3 %v3115_v13 }
 0x314   :  { %3151 = vrot.lane.b32.xlu2 %v3150_v23, %s3192_s26  ;;  %v1148_v23 = vpack.c.bf16 %v2622_v16, %v2622_v16  ;;  %v1543_v24 = vor.u32 %v1542_v19, %v1538_v18  ;;  %v3114_v16 = vld [vmem:[%s3985_s3 + $0x40] sm:$0xff]  ;;  %v3119_v18 = vld [vmem:[%s3985_s3 + $0x68] sm:$0xff]  ;;  %v3113_v19 = vld [vmem:[%s3985_s3 + $0x38] sm:$0xff] }
 0x316   :  { %1563 = vmatmul.bf16.vlgmr.msrb.gmra.mxu3 %v1543_v24  ;;  %v3117_v24 = vld [vmem:[%s3985_s3 + $0x58] sm:$0xff] }
 0x317   :  { %1774 = vmatpush.bf16.msra.mxu1 %v3119_v18  ;;  %1792 = vmatpush.bf16.msra.mxu3 %v3114_v16 }
 0x31b   :  { %1793 = vmatpush.bf16.msra.mxu3 %v3113_v19 }
 0x36e   :  { %v3152_v49 = vpop.permute.xlu2 %3151 }
 0x36f   :  { %v3154_v50 = vunpack.i.h.bf16 %v3152_v49  ;;  %v3153_v51 = vunpack.i.l.bf16 %v3152_v49 }
 0x371   :  { %v1031_v54 = vmax.f32 %v1021_v21, %v3154_v50  ;;  %v1026_v55 = vmax.f32 %v1020_v22, %v3153_v51  ;;  %v2628_v21 = vld [vmem:[%s3982_s0 + $0x68] sm:$0xfe]  ;;  %v2630_v22 = vld [vmem:[%s3982_s0 + $0x78] sm:$0x1] }
 0x372   :  { %v1160_v25 = vpack.c.bf16 %v2630_v22, %v2628_v21  ;;  %v3118_v21 = vld [vmem:[%s3985_s3 + $0x60] sm:$0xff]  ;;  %v3112_v22 = vld [vmem:[%s3985_s3 + $0x30] sm:$0xff] }
 0x373   :  { %v1032_v62 = vmax.f32 %v1026_v55, %v1031_v54  ;;  %1775 = vmatpush.bf16.msra.mxu1 %v3118_v21  ;;  %1794 = vmatpush.bf16.msra.mxu3 %v3112_v22 }
 0x374   :  { %v1547_v28 = vshll.u32 %v1160_v25, 16  ;;  %v1545_v29 = vshrl.u32 %v1160_v25, 16  ;;  %v3111_v25 = vld [vmem:[%s3985_s3 + $0x28] sm:$0xff] }
 0x375   :  { %v1034_v3 = vpack.c.bf16 %v1032_v62, %v1032_v62 }
 0x376   :  { %v1549_v31 = vrot.slane %v1547_v28, 1  ;;  %v3116_v28 = vld [vmem:[%s3985_s3 + $0x50] sm:$0xff] }
 0x377   :  { %v1094_v7 = vshrl.u32 %v1034_v3, 16  ;;  %2593 = vmatmul.msk.bf16.vlgmr.msrb.gmra.mxu0 %vm1067_vm13, %v1034_v3  ;;  %1776 = vmatpush.bf16.msra.mxu1 %v3117_v24 }
 0x378   :  { %1454 = vmatpush.bf16.msrb.mxu0 %v3104_v41  ;;  %v1550_v32 = vor.u32 %v1549_v31, %v1545_v29  ;;  %1795 = vmatpush.bf16.msra.mxu3 %v3111_v25 }
 0x379   :  { %2618 = vmatmul.msk.bf16.vlgmr.msrb.gmra.mxu2 %vm1067_vm13, %v1094_v7 }
 0x37a   :  { %1474 = vmatpush.bf16.msrb.mxu2 %v3105_v5  ;;  %2780 = vmatmul.msk.bf16.vlgmr.msrb.gmra.mxu1 %vm176_vm0, %v1550_v32 }
 0x37b   :  { %1777 = vmatpush.bf16.msra.mxu1 %v3116_v28 }
 0x37c   :  { %1455 = vmatpush.bf16.msrb.mxu0 %v3103_v44 }
 0x380   :  { %1456 = vmatpush.bf16.msrb.mxu0 %v3102_v45 }
 0x384   :  { %1457 = vmatpush.bf16.msrb.mxu0 %v3101_v53 }
 0x387   :  { %2703 = vmatmul.msk.bf16.vlgmr.msra.gmra.mxu0 %vm176_vm0, %v1148_v23 }
 0x388   :  { %1458 = vmatpush.bf16.msrb.mxu0 %v3100_v1 }
 0x389   :  { %2740 = vmatmul.msk.bf16.vlgmr.msra.gmra.mxu2 %vm176_vm0, %v1143_v27  ;;  %v3106_v27 = vld [vmem:[%s3985_s3] sm:$0xff] }
 0x38a   :  { %1511 = vmatpush.bf16.msra.mxu2 %v3594_v56  ;;  %v1282_v56 = vpop.f32.mrf.mxu1 }
 0x38c   :  { %1459 = vmatpush.bf16.msrb.mxu0 %v3099_v9 }
 0x38e   :  { %1512 = vmatpush.bf16.msra.mxu2 %v3609_v60  ;;  %v1365_v60 = vpop.f32.mrf.mxu3 }
 0x390   :  { %1460 = vmatpush.bf16.msrb.mxu0 %v3098_v11 }
 0x392   :  { %1513 = vmatpush.bf16.msra.mxu2 %v3630_v2  ;;  %v1284_v2 = vpop.f32.mrf.mxu1 }
 0x394   :  { %1461 = vmatpush.bf16.msrb.mxu0 %v3097_v17  ;;  %v3109_v17 = vld [vmem:[%s3985_s3 + $0x18] sm:$0xff] }
 0x396   :  { %1514 = vmatpush.bf16.msra.mxu2 %v3659_v26  ;;  %v1367_v34 = vpop.f32.mrf.mxu3 }
 0x397   :  { %1462 = vmatmul.bf16.vlgmr.msrb.gmra.mxu0 %v1388_v10 }
 0x398   :  { %1531 = vmatpush.bf16.msra.mxu0 %v3697_v36 }
 0x399   :  { %2777 = vmatmul.msk.bf16.vlgmr.msrb.gmra.mxu2 %vm176_vm0, %v1395_v63 }
 0x39a   :  { %1515 = vmatpush.bf16.msra.mxu2 %v3674_v30  ;;  %v1494_v30 = vpop.f32.mrf.mxu1 }
 0x39c   :  { %1681 = vmatpush.bf16.msrb.mxu0 %v3115_v13  ;;  %v3121_v13 = vld [vmem:[%s3987_s5] sm:$0xff] }
 0x39e   :  { %1516 = vmatpush.bf16.msra.mxu2 %v3686_v33  ;;  %v1507_v36 = vpop.f32.mrf.mxu3 }
 0x39f   :  { %v1508_v3 = vadd.f32 %v1507_v36, %v1494_v30 }
 0x3a0   :  { %1682 = vmatpush.bf16.msrb.mxu0 %v3114_v16 }
 0x3a2   :  { %1517 = vmatpush.bf16.msra.mxu2 %v3703_v37  ;;  %v1496_v40 = vpop.f32.mrf.mxu1 }
 0x3a4   :  { %1683 = vmatpush.bf16.msrb.mxu0 %v3113_v19 }
 0x3a6   :  { %1518 = vmatpush.bf16.msra.mxu2 %v3711_v38  ;;  %v1509_v41 = vpop.f32.mrf.mxu3 }
 0x3a7   :  { %2779 = vmatmul.msk.bf16.vlgmr.msra.gmra.mxu0 %vm176_vm0, %v1148_v23  ;;  %v3107_v23 = vld [vmem:[%s3985_s3 + $0x8] sm:$0xff] }
 0x3a8   :  { %1684 = vmatpush.bf16.msrb.mxu0 %v3112_v22 }
 0x3a9   :  { %1519 = vmatmul.bf16.vlgmr.msra.gmra.mxu2 %v3725_v43 }
 0x3aa   :  { %1727 = vmatpush.bf16.msrb.mxu2 %v3110_v14 }
 0x3ac   :  { %1685 = vmatpush.bf16.msrb.mxu0 %v3111_v25 }
 0x3ae   :  { %v1564_v44 = vpop.f32.mrf.mxu3  ;;  %1728 = vmatpush.bf16.msrb.mxu2 %v3109_v17 }
 0x3b0   :  { %1804 = vmatpush.bf16.msra.mxu0 %v3110_v14  ;;  %v3134_v14 = vld [vmem:[%s3987_s5 + $0x68] sm:$0xff] }
 0x3b2   :  { %1729 = vmatpush.bf16.msrb.mxu2 %v3108_v20 }
 0x3b4   :  { %1805 = vmatpush.bf16.msra.mxu0 %v3109_v17 }
 0x3b6   :  { %v1566_v48 = vpop.f32.mrf.mxu3  ;;  %1730 = vmatpush.bf16.msrb.mxu2 %v3107_v23 }
 0x3b8   :  { %1806 = vmatpush.bf16.msra.mxu0 %v3108_v20 }
 0x3ba   :  { %1731 = vmatpush.bf16.msrb.mxu2 %v3106_v27 }
 0x3bc   :  { %1807 = vmatpush.bf16.msra.mxu0 %v3107_v23 }
 0x3be   :  { %1820 = vmatpush.bf16.msra.mxu2 %v3120_v15  ;;  %v3133_v15 = vld [vmem:[%s3987_s5 + $0x60] sm:$0xff] }
 0x3c0   :  { %1808 = vmatpush.bf16.msra.mxu0 %v3106_v27 }
 0x3c2   :  { %1821 = vmatpush.bf16.msra.mxu2 %v3119_v18 }
 0x3c6   :  { %1822 = vmatpush.bf16.msra.mxu2 %v3118_v21 }
 0x3ca   :  { %1823 = vmatpush.bf16.msra.mxu2 %v3117_v24 }
 0x3ce   :  { %1824 = vmatpush.bf16.msra.mxu2 %v3116_v28 }
 0x3f4   :  { %v1080_v26 = vpop.f32.mrf.mxu0 }
 0x3f5   :  { %v1084_v33 = vadd.f32 %v1080_v26, %v1033_v35 }
 0x3f7   :  { %v1577_v45 = vpop.f32.mrf.mxu1 }
 0x3f8   :  { %v1578_v6 = vadd.f32 %v1577_v45, %v1564_v44  ;;  %v3164_v44 = vld [vmem:[%s3986_s4] ss:$0 sm:$0xff] }
 0x3fc   :  { %v1082_v39 = vpop.f32.mrf.mxu0  ;;  %v1132_v37 = vpop.f32.mrf.mxu2 }
 0x3fd   :  { %v1136_v38 = vadd.f32 %v1132_v37, %v1084_v33  ;;  %v3132_v37 = vld [vmem:[%s3987_s5 + $0x58] sm:$0xff] }
 0x3fe   :  { %1937 = vmatpush.bf16.msrb.mxu1 %v3132_v37 }
 0x3ff   :  { %1138 = vst.msk [vmem:[#allocation4] sm:$0x1] %vm1137_vm14, %v1136_v38  ;;  %v1579_v49 = vpop.f32.mrf.mxu1  ;;  %v3126_v38 = vld [vmem:[%s3987_s5 + $0x28] sm:$0xff] }
 0x400   :  { %1989 = vmatpush.bf16.msrb.mxu3 %v3126_v38 }
 0x404   :  { %v1134_v42 = vpop.f32.mrf.mxu2  ;;  %v1295_v43 = vpop.f32.mrf.mxu0 }
 0x405   :  { %v1296_v52 = vadd.f32 %v1295_v43, %v1282_v56 }
 0x407   :  { %v1366_v53 = vadd.f32 %v1365_v60, %v1296_v52 }
 0x40c   :  { %v1378_v46 = vpop.f32.mrf.mxu2  ;;  %v1297_v47 = vpop.f32.mrf.mxu0 }
 0x40d   :  { %v1379_v57 = vadd.f32 %v1378_v46, %v1366_v53 }
 0x414   :  { %v1380_v50 = vpop.f32.mrf.mxu2  ;;  %v1463_v51 = vpop.f32.mrf.mxu0 }
 0x41c   :  { %v1476_v54 = vpop.f32.mrf.mxu2  ;;  %v1465_v55 = vpop.f32.mrf.mxu0 }
 0x41d   :  { %v1477_v58 = vadd.f32 %v1476_v54, %v1463_v51 }
 0x41f   :  { %v1480_v61 = vadd.f32 %v1477_v58, %v1379_v57 }
 0x421   :  { %v1484_v62 = vadd.f32 %v3163_v59, %v1480_v61 }
 0x423   :  { %v1583_v63 = vmax.f32 %v1484_v62, 0.0 }
 0x424   :  { %v1478_v0 = vpop.f32.mrf.mxu2  ;;  %v1533_v1 = vpop.f32.mrf.mxu0 }
 0x425   :  { %1586 = vrot.lane.b32.xlu2 %v1583_v63, %s3192_s26  ;;  %v3125_v0 = vld [vmem:[%s3987_s5 + $0x20] sm:$0xff] }
 0x426   :  { %1990 = vmatpush.bf16.msrb.mxu3 %v3125_v0 }
 0x42c   :  { %v1520_v4 = vpop.f32.mrf.mxu2  ;;  %v1535_v5 = vpop.f32.mrf.mxu0 }
 0x42d   :  { %v1521_v7 = vadd.f32 %v1520_v4, %v1508_v3  ;;  %v3130_v3 = vld [vmem:[%s3987_s5 + $0x48] sm:$0xff]  ;;  %v3124_v4 = vld [vmem:[%s3987_s5 + $0x18] sm:$0xff]  ;;  %v3137_v5 = vld [vmem:[%s3987_s5 + $0x80] sm:$0xff] }
 0x42e   :  { %1991 = vmatpush.bf16.msrb.mxu3 %v3124_v4 }
 0x42f   :  { %v1534_v8 = vadd.f32 %v1533_v1, %v1521_v7  ;;  %v3138_v1 = vld [vmem:[%s3987_s5 + $0x88] sm:$0xff]  ;;  %v3123_v7 = vld [vmem:[%s3987_s5 + $0x10] sm:$0xff] }
 0x431   :  { %v1581_v9 = vadd.f32 %v1578_v6, %v1534_v8  ;;  %v3129_v6 = vld [vmem:[%s3987_s5 + $0x40] sm:$0xff]  ;;  %v3136_v8 = vld [vmem:[%s3987_s5 + $0x78] sm:$0xff] }
 0x432   :  { %1992 = vmatpush.bf16.msrb.mxu3 %v3123_v7 }
 0x433   :  { %v1582_v10 = vadd.f32 %v3163_v59, %v1581_v9  ;;  %v3128_v9 = vld [vmem:[%s3987_s5 + $0x38] sm:$0xff] }
 0x434   :  { %v1522_v11 = vpop.f32.mrf.mxu2 }
 0x435   :  { %v1584_v12 = vmax.f32 %v1582_v10, 0.0  ;;  %v3122_v10 = vld [vmem:[%s3987_s5 + $0x8] sm:$0xff]  ;;  %v3135_v11 = vld [vmem:[%s3987_s5 + $0x70] sm:$0xff] }
 0x436   :  { %1993 = vmatpush.bf16.msrb.mxu3 %v3122_v10 }
 0x437   :  { %1591 = vrot.lane.b32.xlu0 %v1584_v12, %s3192_s26 }
 0x43a   :  { %1994 = vmatpush.bf16.msrb.mxu3 %v3121_v13 }
 0x47f   :  { %v1587_v29 = vpop.permute.xlu2 %1586 }
 0x480   :  { %v1589_v32 = vmax.f32 %v1583_v63, %v1587_v29  ;;  %v3131_v63 = vld [vmem:[%s3987_s5 + $0x50] sm:$0xff] }
 0x481   :  { %1938 = vmatpush.bf16.msrb.mxu1 %v3131_v63 }
 0x485   :  { %1939 = vmatpush.bf16.msrb.mxu1 %v3130_v3 }
 0x489   :  { %1940 = vmatpush.bf16.msrb.mxu1 %v3129_v6 }
 0x48d   :  { %1941 = vmatpush.bf16.msrb.mxu1 %v3128_v9 }
 0x4a9   :  { %v1592_v31 = vpop.permute.xlu0 %1591 }
 0x4aa   :  { %v1594_v56 = vmax.f32 %v1584_v12, %v1592_v31  ;;  %v3127_v12 = vld [vmem:[%s3987_s5 + $0x30] sm:$0xff]  ;;  %v3142_v31 = vld [vmem:[%s3989_s7 + $0x18] sm:$0xff] }
 0x4ab   :  { %1942 = vmatpush.bf16.msrb.mxu1 %v3127_v12 }
 0x4ac   :  { %v1595_v60 = vmax.f32 %v1589_v32, %v1594_v56  ;;  %v3146_v32 = vld [vmem:[%s3989_s7 + $0x38] sm:$0xff] }
 0x4ae   :  { %1597 = vst.msk [vmem:[#allocation2 + $0x18] sm:$0x1] %vm504_vm2, %v1595_v60 }
 0x4af   :  { %1599 = vst.msk [vmem:[#allocation2 + $0x8] sm:$0x2] %vm506_vm3, %v1595_v60 }
 0x4b0   :  { %1600 = vst.msk [vmem:[#allocation2 + $0x17] sm:$0x4] %vm508_vm4, %v1595_v60 }
 0x4b1   :  { %1601 = vst.msk [vmem:[#allocation2 + $0x7] sm:$0x8] %vm510_vm5, %v1595_v60 }
 0x4b2   :  { %1602 = vst.msk [vmem:[#allocation2 + $0x16] sm:$0x10] %vm512_vm6, %v1595_v60 }
 0x4b3   :  { %1603 = vst.msk [vmem:[#allocation2 + $0x6] sm:$0x20] %vm514_vm7, %v1595_v60 }
 0x4b4   :  { %1604 = vst.msk [vmem:[#allocation2 + $0x15] sm:$0x40] %vm516_vm8, %v1595_v60 }
 0x4b5   :  { %1605 = vst.msk [vmem:[#allocation2 + $0x5] sm:$0x80] %vm518_vm9, %v1595_v60  ;;  %v3141_v60 = vld [vmem:[%s3989_s7 + $0x10] sm:$0xff] }
 0x4ba   :  { %v1606_v2 = vld [vmem:[#allocation2 + $0x8] sm:$0xf] }
 0x4bb   :  { %v1608_v34 = vld [vmem:[#allocation2 + $0x18] sm:$0xf]  ;;  %v1607_v26 = vpack.c.bf16 %v1606_v2, %v1606_v2  ;;  %v3145_v2 = vld [vmem:[%s3989_s7 + $0x30] sm:$0xff] }
 0x4bc   :  { %v1609_v35 = vpack.c.bf16 %v1608_v34, %v1608_v34  ;;  %v1610_v30 = vld [vmem:[#allocation2 + $0x9] sm:$0xf]  ;;  %v1612_v33 = vld [vmem:[#allocation2 + $0x19] sm:$0xf] }
 0x4bd   :  { %2842 = vmatmul.msk.bf16.vlgmr.msrb.gmra.mxu2 %vm591_vm10, %v1607_v26  ;;  %v1611_v36 = vpack.c.bf16 %v1610_v30, %v1610_v30  ;;  %v1613_v39 = vpack.c.bf16 %v1612_v33, %v1612_v33 }
 0x4be   :  { %2821 = vmatmul.msk.bf16.vlgmr.msrb.gmra.mxu0 %vm591_vm10, %v1609_v35  ;;  %2059 = vmatpush.bf16.msrb.mxu2 %v3132_v37 }
 0x4bf   :  { %2863 = vmatmul.msk.bf16.vlgmr.msra.gmra.mxu1 %vm591_vm10, %v1611_v36  ;;  %2864 = vmatmul.msk.bf16.vlgmr.msra.gmra.mxu3 %vm591_vm10, %v1611_v36 }
 0x4c0   :  { %2041 = vmatpush.bf16.msrb.mxu0 %v3138_v1  ;;  %2072 = vmatpush.bf16.msra.mxu1 %v3126_v38 }
 0x4c1   :  { %2088 = vmatpush.bf16.msra.mxu3 %v3138_v1 }
 0x4c2   :  { %2060 = vmatpush.bf16.msrb.mxu2 %v3131_v63 }
 0x4c4   :  { %2042 = vmatpush.bf16.msrb.mxu0 %v3137_v5  ;;  %2073 = vmatpush.bf16.msra.mxu1 %v3125_v0 }
 0x4c5   :  { %2089 = vmatpush.bf16.msra.mxu3 %v3137_v5 }
 0x4c6   :  { %2061 = vmatpush.bf16.msrb.mxu2 %v3130_v3 }
 0x4c8   :  { %2043 = vmatpush.bf16.msrb.mxu0 %v3136_v8  ;;  %2074 = vmatpush.bf16.msra.mxu1 %v3124_v4  ;;  %v2114_v4 = vld [vmem:[%s3990_s8] sm:$0x1] }
 0x4c9   :  { %2090 = vmatpush.bf16.msra.mxu3 %v3136_v8 }
 0x4ca   :  { %2062 = vmatpush.bf16.msrb.mxu2 %v3129_v6 }
 0x4cc   :  { %2044 = vmatpush.bf16.msrb.mxu0 %v3135_v11  ;;  %2075 = vmatpush.bf16.msra.mxu1 %v3123_v7 }
 0x4cd   :  { %2866 = vmatmul.msk.bf16.vlgmr.msra.gmra.mxu2 %vm591_vm10, %v1613_v39  ;;  %2091 = vmatpush.bf16.msra.mxu3 %v3135_v11 }
 0x4ce   :  { %2865 = vmatmul.msk.bf16.vlgmr.msra.gmra.mxu0 %vm591_vm10, %v1609_v35  ;;  %2063 = vmatpush.bf16.msrb.mxu2 %v3128_v9 }
 0x4d0   :  { %2045 = vmatpush.bf16.msrb.mxu0 %v3134_v14  ;;  %2076 = vmatpush.bf16.msra.mxu1 %v3122_v10 }
 0x4d1   :  { %2092 = vmatpush.bf16.msra.mxu3 %v3134_v14 }
 0x4d2   :  { %2064 = vmatpush.bf16.msrb.mxu2 %v3127_v12 }
 0x4d4   :  { %2046 = vmatpush.bf16.msrb.mxu0 %v3133_v15  ;;  %2077 = vmatpush.bf16.msra.mxu1 %v3121_v13 }
 0x4d5   :  { %2093 = vmatpush.bf16.msra.mxu3 %v3133_v15 }
 0x4d6   :  { %2206 = vmatpush.bf16.msra.mxu2 %v3146_v32 }
 0x4d8   :  { %2155 = vmatpush.bf16.msra.mxu0 %v3142_v31 }
 0x4da   :  { %2207 = vmatpush.bf16.msra.mxu2 %v3145_v2 }
 0x4dc   :  { %2156 = vmatpush.bf16.msra.mxu0 %v3141_v60 }
 0x53b   :  { %v1687_v40 = vpop.f32.mrf.mxu0 }
 0x53c   :  { %v1779_v41 = vpop.f32.mrf.mxu1 }
 0x540   :  { %v1733_v42 = vpop.f32.mrf.mxu2 }
 0x541   :  { %v1734_v43 = vadd.f32 %v1733_v42, %v1687_v40 }
 0x542   :  { %v1797_v45 = vpop.f32.mrf.mxu3 }
 0x543   :  { %v1783_v46 = vadd.f32 %v1779_v41, %v1734_v43  ;;  %v1689_v47 = vpop.f32.mrf.mxu0  ;;  %v3165_v41 = vld [vmem:[%s3988_s6] ss:$0 sm:$0xff] }
 0x544   :  { %v1781_v48 = vpop.f32.mrf.mxu1 }
 0x545   :  { %v3878_v49 = vadd.f32 %v3164_v44, %v1783_v46 }
 0x547   :  { %v1832_v50 = vmax.f32 %v3878_v49, 0.0 }
 0x548   :  { %v1735_v51 = vpop.f32.mrf.mxu2 }
 0x549   :  { %1835 = vrot.lane.b32.xlu1 %v1832_v50, %s3192_s26 }
 0x54a   :  { %v1799_v52 = vpop.f32.mrf.mxu3 }
 0x54b   :  { %v1810_v53 = vpop.f32.mrf.mxu0  ;;  %v3140_v52 = vld [vmem:[%s3989_s7 + $0x8] sm:$0xff] }
 0x54c   :  { %v1811_v54 = vadd.f32 %v1810_v53, %v1797_v45  ;;  %2157 = vmatpush.bf16.msra.mxu0 %v3140_v52  ;;  %v3144_v53 = vld [vmem:[%s3989_s7 + $0x28] sm:$0xff] }
 0x54d   :  { %2208 = vmatpush.bf16.msra.mxu2 %v3144_v53 }
 0x550   :  { %v1826_v55 = vpop.f32.mrf.mxu2 }
 0x551   :  { %v1830_v57 = vadd.f32 %v1826_v55, %v1811_v54  ;;  %v3139_v54 = vld [vmem:[%s3989_s7] sm:$0xff] }
 0x552   :  { %2158 = vmatpush.bf16.msra.mxu0 %v3139_v54  ;;  %v3143_v55 = vld [vmem:[%s3989_s7 + $0x20] sm:$0xff]  ;;  %s2222_s7 = sshll.u32 %s3194_s22, 4  ;;  %s2223_s7 = int_to_ptr.vmem [resolvable:$true] %s2222_s7 }
 0x553   :  { %v1831_v58 = vadd.f32 %v3164_v44, %v1830_v57  ;;  %v1812_v59 = vpop.f32.mrf.mxu0  ;;  %2209 = vmatpush.bf16.msra.mxu2 %v3143_v55 }
 0x555   :  { %v1833_v61 = vmax.f32 %v1831_v58, 0.0 }
 0x557   :  { %1840 = vrot.lane.b32.xlu2 %v1833_v61, %s3192_s26 }
 0x558   :  { %v1828_v62 = vpop.f32.mrf.mxu2 }
 0x5b1   :  { %v1841_v16 = vpop.permute.xlu2 %1840 }
 0x5b2   :  { %v1843_v18 = vmax.f32 %v1833_v61, %v1841_v16 }
 0x5bb   :  { %v1836_v17 = vpop.permute.xlu1 %1835 }
 0x5bc   :  { %v1838_v19 = vmax.f32 %v1832_v50, %v1836_v17 }
 0x5be   :  { %v1844_v20 = vmax.f32 %v1838_v19, %v1843_v18 }
 0x5c0   :  { %1846 = vst.msk [vmem:[#allocation3 + $0xc] sm:$0x1] %vm504_vm2, %v1844_v20 }
 0x5c1   :  { %1848 = vst.msk [vmem:[#allocation3 + $0x4] sm:$0x2] %vm506_vm3, %v1844_v20 }
 0x5c2   :  { %1849 = vst.msk [vmem:[#allocation3 + $0xb] sm:$0x4] %vm508_vm4, %v1844_v20 }
 0x5c3   :  { %1850 = vst.msk [vmem:[#allocation3 + $0x3] sm:$0x8] %vm510_vm5, %v1844_v20 }
 0x5c8   :  { %v1851_v21 = vld [vmem:[#allocation3 + $0x4] sm:$0x3] }
 0x5c9   :  { %v1853_v22 = vld [vmem:[#allocation3 + $0xc] sm:$0x3]  ;;  %v1852_v23 = vpack.c.bf16 %v1851_v21, %v1851_v21 }
 0x5ca   :  { %v1854_v24 = vpack.c.bf16 %v1853_v22, %v1853_v22  ;;  %v1855_v25 = vld [vmem:[#allocation3 + $0x5] sm:$0x3]  ;;  %v1857_v28 = vld [vmem:[#allocation3 + $0xd] sm:$0x3] }
 0x5cb   :  { %2940 = vmatmul.msk.bf16.vlgmr.msrb.gmra.mxu3 %vm850_vm12, %v1852_v23  ;;  %v1856_v27 = vpack.c.bf16 %v1855_v25, %v1855_v25  ;;  %v1858_v29 = vpack.c.bf16 %v1857_v28, %v1857_v28 }
 0x5cc   :  { %2915 = vmatmul.msk.bf16.vlgmr.msrb.gmra.mxu1 %vm850_vm12, %v1854_v24 }
 0x5cd   :  { %2965 = vmatmul.msk.bf16.vlgmr.msrb.gmra.mxu0 %vm850_vm12, %v1856_v27  ;;  %2966 = vmatmul.msk.bf16.vlgmr.msrb.gmra.mxu2 %vm850_vm12, %v1856_v27 }
 0x5db   :  { %2968 = vmatmul.msk.bf16.vlgmr.msra.gmra.mxu3 %vm850_vm12, %v1858_v29 }
 0x5dc   :  { %2967 = vmatmul.msk.bf16.vlgmr.msra.gmra.mxu1 %vm850_vm12, %v1854_v24 }
 0x649   :  { %v1944_v56 = vpop.f32.mrf.mxu1 }
 0x64a   :  { %v2048_v34 = vpop.f32.mrf.mxu0 }
 0x64e   :  { %v1996_v26 = vpop.f32.mrf.mxu3 }
 0x64f   :  { %v1997_v39 = vadd.f32 %v1996_v26, %v1944_v56 }
 0x650   :  { %v2066_v35 = vpop.f32.mrf.mxu2 }
 0x651   :  { %v1946_v30 = vpop.f32.mrf.mxu1  ;;  %v2052_v40 = vadd.f32 %v2048_v34, %v1997_v39 }
 0x652   :  { %v2050_v36 = vpop.f32.mrf.mxu0 }
 0x653   :  { %v2056_v44 = vadd.f32 %v3165_v41, %v2052_v40 }
 0x655   :  { %v2101_v48 = vmax.f32 %v2056_v44, 0.0 }
 0x656   :  { %v1998_v33 = vpop.f32.mrf.mxu3 }
 0x658   :  { %v2068_v37 = vpop.f32.mrf.mxu2 }
 0x659   :  { %v2079_v38 = vpop.f32.mrf.mxu1 }
 0x65a   :  { %v2080_v42 = vadd.f32 %v2079_v38, %v2066_v35 }
 0x65e   :  { %v2095_v43 = vpop.f32.mrf.mxu3 }
 0x65f   :  { %v2099_v45 = vadd.f32 %v2095_v43, %v2080_v42 }
 0x661   :  { %v2100_v46 = vadd.f32 %v3165_v41, %v2099_v45  ;;  %v2081_v47 = vpop.f32.mrf.mxu1 }
 0x663   :  { %v2102_v49 = vmax.f32 %v2100_v46, 0.0 }
 0x665   :  { %v3155_v50 = vpack.i.bf16 %v2102_v49, %v2101_v48 }
 0x666   :  { %v2097_v51 = vpop.f32.mrf.mxu3 }
 0x667   :  { %3156 = vrot.lane.b32.xlu0 %v3155_v50, %s3192_s26 }
 0x6d9   :  { %v3157_v57 = vpop.permute.xlu0 %3156 }
 0x6da   :  { %v3159_v58 = vunpack.i.h.bf16 %v3157_v57  ;;  %v3158_v59 = vunpack.i.l.bf16 %v3157_v57 }
 0x6dc   :  { %v2112_v61 = vmax.f32 %v2102_v49, %v3159_v58  ;;  %v2107_v62 = vmax.f32 %v2101_v48, %v3158_v59 }
 0x6de   :  { %v2113_v63 = vmax.f32 %v2107_v62, %v2112_v61 }
 0x6e0   :  { %v2115_v0 = vpack.c.bf16 %v2113_v63, %v2113_v63 }
 0x6e2   :  { %v2173_v1 = vshrl.u32 %v2115_v0, 16  ;;  %2985 = vmatmul.msk.bf16.vlgmr.msra.gmra.mxu0 %vm1067_vm13, %v2115_v0 }
 0x6e4   :  { %3010 = vmatmul.msk.bf16.vlgmr.msra.gmra.mxu2 %vm1067_vm13, %v2173_v1 }
 0x75f   :  { %v2160_v3 = vpop.f32.mrf.mxu0 }
 0x760   :  { %v2164_v5 = vadd.f32 %v2160_v3, %v2114_v4 }
 0x767   :  { %v2162_v6 = vpop.f32.mrf.mxu0  ;;  %v2211_v7 = vpop.f32.mrf.mxu2 }
 0x768   :  { %v2215_v8 = vadd.f32 %v2211_v7, %v2164_v5 }
 0x76a   :  { %2216 = vst.msk [vmem:[#allocation4 + $0x1] sm:$0x1] %vm1137_vm14, %v2215_v8 }
 0x76b   :  { %2227 = dma.vmem_to_hbm [thread:$0]  %s2223_s7, 32, %s2225_s24, [#allocation5]  }
 0x76f   :  { %v2213_v9 = vpop.f32.mrf.mxu2 }
 0x770   :  { %3190 = dma.done.wait [#allocation5], 32  }
 0x771   :  { %3191 = vsyncadd [#allocation5], 4294967264 }
 0x772   :  { %2232 = vsyncpa [#allocation5], 1 }

</bundles_post_ra>
